<compile_context>
chip_gen: v7x
topology: tpu7x:2x2x1
jax: 0.10.0
libtpu: 0.0.40
codegen_flags: <defaults>
</compile_context>

<pallas_src>
import jax
import jax.numpy as jnp
from jax.experimental import pallas as pl
from jax.experimental.pallas import tpu as pltpu

_GATHER_UNROLL = 8  # rows issued per chunk; the row tile R is always a multiple


def bert_embedding_kernel(tok_ids_smem,   # (B*S_pad,) int32  scalar-prefetch (SMEM)
                          seg_ids_ref,    # (R, 1) int32      VMEM
                          tok_tab_hbm,    # (vocab, D)        HBM (pl.ANY)
                          seg_tab_ref,    # (nseg, D)         VMEM
                          pos_ref,        # (R, D)            VMEM
                          out_ref,        # (R, D)            VMEM
                          gather_buf,     # (2, R, D)         VMEM scratch (token rows)
                          gather_sem):    # (2,)              DMA semaphores
    R, D = out_ref.shape
    vocab = tok_tab_hbm.shape[0]
    nseg = seg_tab_ref.shape[0]

    s = pl.program_id(0)              # sequence-tile index (outer, "parallel")
    b = pl.program_id(1)              # batch index         (inner, "arbitrary")
    B = pl.num_programs(1)
    S_pad = pl.num_programs(0) * R    # padded sequence length per batch element
    slot = b & 1

    def issue_gather(batch_idx, buf_slot):
        # One row DMA per token; all in flight on gather_sem[buf_slot].
        base = batch_idx * S_pad + s * R

        @pl.loop(0, R // _GATHER_UNROLL)
        def _(chunk):
            r0 = pl.multiple_of(chunk * _GATHER_UNROLL, _GATHER_UNROLL)
            for u in range(_GATHER_UNROLL):   # static unroll: packs issue bundles
                r = r0 + u
                # Clamp so a bad id cannot trip the DMA bounds check.
                # TODO(synk): PyTorch nn.Embedding raises on out-of-range ids instead.
                tok_id = jnp.clip(tok_ids_smem[base + r], 0, vocab - 1)
                pltpu.make_async_copy(
                    tok_tab_hbm.at[pl.ds(tok_id, 1), :],
                    gather_buf.at[buf_slot, pl.ds(r, 1), :],
                    gather_sem.at[buf_slot]).start()

    # First inner step of each sequence tile: nothing was prefetched for us.
    @pl.when(b == 0)
    def _():
        issue_gather(b, slot)

    # Cross-step prefetch: issue the NEXT batch element's rows into the other slot
    # before blocking, so gather latency hides behind this step's adds / writeback.
    @pl.when(b + 1 < B)
    def _():
        issue_gather(b + 1, 1 - slot)

    # Single wait sized to the whole (R, D) slab: drains exactly R row-copies of
    # identical byte count (no per-row wait loop, no repeated .wait() calls).
    pltpu.make_async_copy(tok_tab_hbm.at[pl.ds(0, R), :],
                          gather_buf.at[slot],
                          gather_sem.at[slot]).wait()

    tok_emb = gather_buf[slot].astype(jnp.float32)                      # (R, D)

    # ---- segment embedding: unrolled VPU select over the tiny segment table ----
    seg_ids = seg_ids_ref[...]                                          # (R, 1) int32
    seg_rows = seg_tab_ref[...].astype(jnp.float32)                     # (nseg, D)
    seg_emb = jnp.broadcast_to(seg_rows[0:1, :], (R, D))
    for k in range(1, nseg):
        seg_emb = jnp.where(seg_ids == k, seg_rows[k:k + 1, :], seg_emb)

    # ---- sum; dropout(p=0.1) is identity at inference ----
    # TODO(synk): training-mode dropout not applied; inference forward only.
    out_ref[...] = (tok_emb + seg_emb + pos_ref[...].astype(jnp.float32)
                    ).astype(out_ref.dtype)


def make_position_encoding(max_len: int, d_model: int) -> jnp.ndarray:
    # Matches the PyTorch PositionEmbedding construction exactly.
    factor = 10000.0 ** (jnp.arange(0, d_model, 2, dtype=jnp.float32) / d_model)
    pos = jnp.arange(0, max_len, dtype=jnp.float32)[:, None]            # (max_len, 1)
    pe = jnp.zeros((max_len, d_model), dtype=jnp.float32)
    pe = pe.at[:, 0::2].set(jnp.sin(pos / factor))
    pe = pe.at[:, 1::2].set(jnp.cos(pos / factor))
    return pe


def _round_up(x: int, m: int) -> int:
    return ((x + m - 1) // m) * m


def bert_embedding(tokens, segment_label, tok_table, seg_table, pos_encoding,
                   *, block_rows: int = 512, out_dtype=None):
    """tokens, segment_label: (B, S) int; returns (B, S, D) in out_dtype
    (defaults to the token-table dtype; pass bf16 tables for half HBM traffic)."""
    B, S = tokens.shape
    vocab, D = tok_table.shape
    nseg = seg_table.shape[0]
    out_dtype = tok_table.dtype if out_dtype is None else out_dtype

    # Row tile: multiple of 8 sublanes, capped at block_rows.  Pad S up to a multiple
    # of R instead of falling back to R = S, so VMEM stays bounded (v7x: 64 MiB).
    R = min(block_rows, _round_up(S, _GATHER_UNROLL))
    R = _round_up(R, _GATHER_UNROLL)
    assert vocab >= R, "vocab must be >= row tile (wait-descriptor byte sizing)"
    S_pad = _round_up(S, R)
    n_seq_tiles = S_pad // R
    pad = S_pad - S

    tok_ids = jnp.pad(tokens.astype(jnp.int32), ((0, 0), (0, pad)))
    seg_ids = jnp.pad(segment_label.astype(jnp.int32), ((0, 0), (0, pad)))
    pos_enc = jnp.pad(pos_encoding[:S, :], ((0, pad), (0, 0)))           # (S_pad, D)

    tok_ids_flat = tok_ids.reshape(B * S_pad)                           # SMEM prefetch
    seg_ids = seg_ids.reshape(B, S_pad, 1)

    grid_spec = pltpu.PrefetchScalarGridSpec(
        num_scalar_prefetch=1,                                          # token ids
        # Batch innermost: the position tile index (s, 0) is constant across the
        # inner axis, so it is fetched once per seq tile instead of once per step.
        grid=(n_seq_tiles, B),
        in_specs=[
            pl.BlockSpec((None, R, 1), lambda s, b, ids: (b, s, 0)),    # segment ids
            pl.BlockSpec(memory_space=pl.ANY),                          # token table (HBM)
            pl.BlockSpec((nseg, D), lambda s, b, ids: (0, 0)),          # segment table
            pl.BlockSpec((R, D), lambda s, b, ids: (s, 0)),             # position enc
        ],
        out_specs=pl.BlockSpec((None, R, D), lambda s, b, ids: (b, s, 0)),
        scratch_shapes=[
            pltpu.VMEM((2, R, D), tok_table.dtype),                     # double-buffered rows
            pltpu.SemaphoreType.DMA((2,)),
        ],
    )

    out = pl.pallas_call(
        bert_embedding_kernel,
        out_shape=jax.ShapeDtypeStruct((B, S_pad, D), out_dtype),
        grid_spec=grid_spec,
        compiler_params=pltpu.CompilerParams(
            # Outer seq axis "parallel" (v7x megacore split); inner batch axis must be
            # "arbitrary" (sequential) for the cross-step gather prefetch.
            dimension_semantics=("parallel", "arbitrary")),
    )(tok_ids_flat, seg_ids, tok_table, seg_table, pos_enc)

    return out if pad == 0 else out[:, :S, :]


if __name__ == "__main__":
    # Small, forward-consistent shapes (lane-dense d_model).
    vocab_size = 256
    d_model = 128
    max_len = 64
    num_segments = 2
    batch = 2
    seq_len = 32

    key = jax.random.PRNGKey(0)
    k_tok, k_seg, k_ids, k_lbl = jax.random.split(key, 4)

    # Deterministic parameter init (nn.Embedding ~ N(0,1)); padding_idx=0 row zeroed.
    tok_table = jax.random.normal(k_tok, (vocab_size, d_model), dtype=jnp.float32)
    tok_table = tok_table.at[0, :].set(0.0)                             # padding_idx=0
    seg_table = jax.random.normal(k_seg, (num_segments, d_model), dtype=jnp.float32)
    pos_encoding = make_position_encoding(max_len, d_model)

    tokens = jax.random.randint(k_ids, (batch, seq_len), 0, vocab_size, dtype=jnp.int32)
    segment_label = jax.random.randint(k_lbl, (batch, seq_len), 0, num_segments,
                                       dtype=jnp.int32)

    # block_rows=16 exercises the seq-tile grid and the cross-step gather prefetch
    # (grid = (2, 2) at these small shapes).
    out = bert_embedding(tokens, segment_label, tok_table, seg_table, pos_encoding,
                         block_rows=16)
    out = jax.block_until_ready(out)

    # Reference check in plain JAX (eval-mode dropout = identity).
    ref = (tok_table[tokens] + seg_table[segment_label]
           + pos_encoding[None, :seq_len, :])
    assert out.shape == (batch, seq_len, d_model)
    assert jnp.allclose(out, ref, atol=1e-5), "mismatch vs reference"

    print("KERNEL_OK")
</pallas_src>

<mosaic_0001>
module attributes {stable_mosaic.version = 11 : i64} {
  func.func @bert_embedding_kernel(%arg0: i32, %arg1: i32, %arg2: memref<64xi32, #tpu.memory_space<smem>>, %arg3: memref<1x16x1xi32, #tpu.memory_space<vmem>>, %arg4: memref<256x128xf32, #tpu.memory_space<any>>, %arg5: memref<2x128xf32, #tpu.memory_space<vmem>>, %arg6: memref<16x128xf32, #tpu.memory_space<vmem>>, %arg7: memref<1x16x128xf32, #tpu.memory_space<vmem>>, %arg8: memref<2x16x128xf32, #tpu.memory_space<vmem>>, %arg9: memref<2x!tpu.dma_semaphore, #tpu.memory_space<semaphore_mem>>) attributes {dimension_semantics = [#tpu.dimension_semantics<parallel>, #tpu.dimension_semantics<arbitrary>], iteration_bounds = array<i64: 2, 2>, scalar_prefetch = 1 : i64, scratch_operands = 2 : i64, tpu.core_type = #tpu.core_type<tc>, window_params = [{transform_indices = @transform_0, window_bounds = array<i64: 1, 16, 1>}, {}, {pipeline_mode = #tpu.pipeline_mode<synchronous>, transform_indices = @transform_2, window_bounds = array<i64: 2, 128>}, {transform_indices = @transform_3, window_bounds = array<i64: 16, 128>}, {transform_indices = @transform_4, window_bounds = array<i64: 1, 16, 128>}]} {
    %c1_i32 = arith.constant 1 : i32
    %0 = arith.andi %arg1, %c1_i32 : i32
    %c0_i32 = arith.constant 0 : i32
    %1 = arith.cmpi eq, %arg1, %c0_i32 : i32
    %2 = arith.extui %1 : i1 to i32
    %c0_i32_0 = arith.constant 0 : i32
    %3 = arith.cmpi ne, %2, %c0_i32_0 : i32
    scf.if %3 {
      %c32_i32 = arith.constant 32 : i32
      %36 = arith.muli %arg1, %c32_i32 : i32
      %c16_i32 = arith.constant 16 : i32
      %37 = arith.muli %arg0, %c16_i32 : i32
      %38 = arith.addi %36, %37 : i32
      %c0_i32_19 = arith.constant 0 : i32
      %c2_i32_20 = arith.constant 2 : i32
      %39 = arith.addi %c0_i32_19, %c2_i32_20 : i32
      %c1_i32_21 = arith.constant 1 : i32
      scf.for %arg10 = %c0_i32_19 to %39 step %c1_i32_21  : i32 {
        %c1_i32_23 = arith.constant 1 : i32
        %40 = arith.muli %arg10, %c1_i32_23 : i32
        %c0_i32_24 = arith.constant 0 : i32
        %41 = arith.addi %c0_i32_24, %40 : i32
        %c8_i32 = arith.constant 8 : i32
        %42 = arith.muli %41, %c8_i32 : i32
        %43 = tpu.assume_multiple %42, 8 : i32
        %c0_i32_25 = arith.constant 0 : i32
        %44 = arith.addi %43, %c0_i32_25 : i32
        %45 = arith.addi %38, %44 : i32
        %46 = arith.index_cast %45 : i32 to index
        %47 = memref.load %arg2[%46] : memref<64xi32, #tpu.memory_space<smem>>
        %c0_i32_26 = arith.constant 0 : i32
        %c255_i32 = arith.constant 255 : i32
        %48 = arith.maxsi %c0_i32_26, %47 : i32
        %49 = arith.minsi %c255_i32, %48 : i32
        %c0_i32_27 = arith.constant 0 : i32
        %50 = tpu.memref_slice %arg4[%49, %c0_i32_27] : memref<256x128xf32, #tpu.memory_space<any>> -> memref<1x128xf32, #tpu.memory_space<any>>
        %c0_i32_28 = arith.constant 0 : i32
        %51 = tpu.memref_slice %arg8[%0, %44, %c0_i32_28] : memref<2x16x128xf32, #tpu.memory_space<vmem>> -> memref<1x1x128xf32, #tpu.memory_space<vmem>>
        %52 = tpu.memref_squeeze %51 : memref<1x1x128xf32, #tpu.memory_space<vmem>> -> memref<1x128xf32, #tpu.memory_space<vmem>>
        %53 = tpu.memref_slice %arg9[%0] : memref<2x!tpu.dma_semaphore, #tpu.memory_space<semaphore_mem>> -> memref<1x!tpu.dma_semaphore, #tpu.memory_space<semaphore_mem>>
        %54 = tpu.memref_squeeze %53 : memref<1x!tpu.dma_semaphore, #tpu.memory_space<semaphore_mem>> -> memref<!tpu.dma_semaphore, #tpu.memory_space<semaphore_mem>>
        tpu.enqueue_dma source(%50 : memref<1x128xf32, #tpu.memory_space<any>>) target(%52 : memref<1x128xf32, #tpu.memory_space<vmem>>) target_semaphore(%54 : memref<!tpu.dma_semaphore, #tpu.memory_space<semaphore_mem>>)
        %c1_i32_29 = arith.constant 1 : i32
        %55 = arith.addi %43, %c1_i32_29 : i32
        %56 = arith.addi %38, %55 : i32
        %57 = arith.index_cast %56 : i32 to index
        %58 = memref.load %arg2[%57] : memref<64xi32, #tpu.memory_space<smem>>
        %c0_i32_30 = arith.constant 0 : i32
        %c255_i32_31 = arith.constant 255 : i32
        %59 = arith.maxsi %c0_i32_30, %58 : i32
        %60 = arith.minsi %c255_i32_31, %59 : i32
        %c0_i32_32 = arith.constant 0 : i32
        %61 = tpu.memref_slice %arg4[%60, %c0_i32_32] : memref<256x128xf32, #tpu.memory_space<any>> -> memref<1x128xf32, #tpu.memory_space<any>>
        %c0_i32_33 = arith.constant 0 : i32
        %62 = tpu.memref_slice %arg8[%0, %55, %c0_i32_33] : memref<2x16x128xf32, #tpu.memory_space<vmem>> -> memref<1x1x128xf32, #tpu.memory_space<vmem>>
        %63 = tpu.memref_squeeze %62 : memref<1x1x128xf32, #tpu.memory_space<vmem>> -> memref<1x128xf32, #tpu.memory_space<vmem>>
        %64 = tpu.memref_slice %arg9[%0] : memref<2x!tpu.dma_semaphore, #tpu.memory_space<semaphore_mem>> -> memref<1x!tpu.dma_semaphore, #tpu.memory_space<semaphore_mem>>
        %65 = tpu.memref_squeeze %64 : memref<1x!tpu.dma_semaphore, #tpu.memory_space<semaphore_mem>> -> memref<!tpu.dma_semaphore, #tpu.memory_space<semaphore_mem>>
        tpu.enqueue_dma source(%61 : memref<1x128xf32, #tpu.memory_space<any>>) target(%63 : memref<1x128xf32, #tpu.memory_space<vmem>>) target_semaphore(%65 : memref<!tpu.dma_semaphore, #tpu.memory_space<semaphore_mem>>)
        %c2_i32_34 = arith.constant 2 : i32
        %66 = arith.addi %43, %c2_i32_34 : i32
        %67 = arith.addi %38, %66 : i32
        %68 = arith.index_cast %67 : i32 to index
        %69 = memref.load %arg2[%68] : memref<64xi32, #tpu.memory_space<smem>>
        %c0_i32_35 = arith.constant 0 : i32
        %c255_i32_36 = arith.constant 255 : i32
        %70 = arith.maxsi %c0_i32_35, %69 : i32
        %71 = arith.minsi %c255_i32_36, %70 : i32
        %c0_i32_37 = arith.constant 0 : i32
        %72 = tpu.memref_slice %arg4[%71, %c0_i32_37] : memref<256x128xf32, #tpu.memory_space<any>> -> memref<1x128xf32, #tpu.memory_space<any>>
        %c0_i32_38 = arith.constant 0 : i32
        %73 = tpu.memref_slice %arg8[%0, %66, %c0_i32_38] : memref<2x16x128xf32, #tpu.memory_space<vmem>> -> memref<1x1x128xf32, #tpu.memory_space<vmem>>
        %74 = tpu.memref_squeeze %73 : memref<1x1x128xf32, #tpu.memory_space<vmem>> -> memref<1x128xf32, #tpu.memory_space<vmem>>
        %75 = tpu.memref_slice %arg9[%0] : memref<2x!tpu.dma_semaphore, #tpu.memory_space<semaphore_mem>> -> memref<1x!tpu.dma_semaphore, #tpu.memory_space<semaphore_mem>>
        %76 = tpu.memref_squeeze %75 : memref<1x!tpu.dma_semaphore, #tpu.memory_space<semaphore_mem>> -> memref<!tpu.dma_semaphore, #tpu.memory_space<semaphore_mem>>
        tpu.enqueue_dma source(%72 : memref<1x128xf32, #tpu.memory_space<any>>) target(%74 : memref<1x128xf32, #tpu.memory_space<vmem>>) target_semaphore(%76 : memref<!tpu.dma_semaphore, #tpu.memory_space<semaphore_mem>>)
        %c3_i32 = arith.constant 3 : i32
        %77 = arith.addi %43, %c3_i32 : i32
        %78 = arith.addi %38, %77 : i32
        %79 = arith.index_cast %78 : i32 to index
        %80 = memref.load %arg2[%79] : memref<64xi32, #tpu.memory_space<smem>>
        %c0_i32_39 = arith.constant 0 : i32
        %c255_i32_40 = arith.constant 255 : i32
        %81 = arith.maxsi %c0_i32_39, %80 : i32
        %82 = arith.minsi %c255_i32_40, %81 : i32
        %c0_i32_41 = arith.constant 0 : i32
        %83 = tpu.memref_slice %arg4[%82, %c0_i32_41] : memref<256x128xf32, #tpu.memory_space<any>> -> memref<1x128xf32, #tpu.memory_space<any>>
        %c0_i32_42 = arith.constant 0 : i32
        %84 = tpu.memref_slice %arg8[%0, %77, %c0_i32_42] : memref<2x16x128xf32, #tpu.memory_space<vmem>> -> memref<1x1x128xf32, #tpu.memory_space<vmem>>
        %85 = tpu.memref_squeeze %84 : memref<1x1x128xf32, #tpu.memory_space<vmem>> -> memref<1x128xf32, #tpu.memory_space<vmem>>
        %86 = tpu.memref_slice %arg9[%0] : memref<2x!tpu.dma_semaphore, #tpu.memory_space<semaphore_mem>> -> memref<1x!tpu.dma_semaphore, #tpu.memory_space<semaphore_mem>>
        %87 = tpu.memref_squeeze %86 : memref<1x!tpu.dma_semaphore, #tpu.memory_space<semaphore_mem>> -> memref<!tpu.dma_semaphore, #tpu.memory_space<semaphore_mem>>
        tpu.enqueue_dma source(%83 : memref<1x128xf32, #tpu.memory_space<any>>) target(%85 : memref<1x128xf32, #tpu.memory_space<vmem>>) target_semaphore(%87 : memref<!tpu.dma_semaphore, #tpu.memory_space<semaphore_mem>>)
        %c4_i32 = arith.constant 4 : i32
        %88 = arith.addi %43, %c4_i32 : i32
        %89 = arith.addi %38, %88 : i32
        %90 = arith.index_cast %89 : i32 to index
        %91 = memref.load %arg2[%90] : memref<64xi32, #tpu.memory_space<smem>>
        %c0_i32_43 = arith.constant 0 : i32
        %c255_i32_44 = arith.constant 255 : i32
        %92 = arith.maxsi %c0_i32_43, %91 : i32
        %93 = arith.minsi %c255_i32_44, %92 : i32
        %c0_i32_45 = arith.constant 0 : i32
        %94 = tpu.memref_slice %arg4[%93, %c0_i32_45] : memref<256x128xf32, #tpu.memory_space<any>> -> memref<1x128xf32, #tpu.memory_space<any>>
        %c0_i32_46 = arith.constant 0 : i32
        %95 = tpu.memref_slice %arg8[%0, %88, %c0_i32_46] : memref<2x16x128xf32, #tpu.memory_space<vmem>> -> memref<1x1x128xf32, #tpu.memory_space<vmem>>
        %96 = tpu.memref_squeeze %95 : memref<1x1x128xf32, #tpu.memory_space<vmem>> -> memref<1x128xf32, #tpu.memory_space<vmem>>
        %97 = tpu.memref_slice %arg9[%0] : memref<2x!tpu.dma_semaphore, #tpu.memory_space<semaphore_mem>> -> memref<1x!tpu.dma_semaphore, #tpu.memory_space<semaphore_mem>>
        %98 = tpu.memref_squeeze %97 : memref<1x!tpu.dma_semaphore, #tpu.memory_space<semaphore_mem>> -> memref<!tpu.dma_semaphore, #tpu.memory_space<semaphore_mem>>
        tpu.enqueue_dma source(%94 : memref<1x128xf32, #tpu.memory_space<any>>) target(%96 : memref<1x128xf32, #tpu.memory_space<vmem>>) target_semaphore(%98 : memref<!tpu.dma_semaphore, #tpu.memory_space<semaphore_mem>>)
        %c5_i32 = arith.constant 5 : i32
        %99 = arith.addi %43, %c5_i32 : i32
        %100 = arith.addi %38, %99 : i32
        %101 = arith.index_cast %100 : i32 to index
        %102 = memref.load %arg2[%101] : memref<64xi32, #tpu.memory_space<smem>>
        %c0_i32_47 = arith.constant 0 : i32
        %c255_i32_48 = arith.constant 255 : i32
        %103 = arith.maxsi %c0_i32_47, %102 : i32
        %104 = arith.minsi %c255_i32_48, %103 : i32
        %c0_i32_49 = arith.constant 0 : i32
        %105 = tpu.memref_slice %arg4[%104, %c0_i32_49] : memref<256x128xf32, #tpu.memory_space<any>> -> memref<1x128xf32, #tpu.memory_space<any>>
        %c0_i32_50 = arith.constant 0 : i32
        %106 = tpu.memref_slice %arg8[%0, %99, %c0_i32_50] : memref<2x16x128xf32, #tpu.memory_space<vmem>> -> memref<1x1x128xf32, #tpu.memory_space<vmem>>
        %107 = tpu.memref_squeeze %106 : memref<1x1x128xf32, #tpu.memory_space<vmem>> -> memref<1x128xf32, #tpu.memory_space<vmem>>
        %108 = tpu.memref_slice %arg9[%0] : memref<2x!tpu.dma_semaphore, #tpu.memory_space<semaphore_mem>> -> memref<1x!tpu.dma_semaphore, #tpu.memory_space<semaphore_mem>>
        %109 = tpu.memref_squeeze %108 : memref<1x!tpu.dma_semaphore, #tpu.memory_space<semaphore_mem>> -> memref<!tpu.dma_semaphore, #tpu.memory_space<semaphore_mem>>
        tpu.enqueue_dma source(%105 : memref<1x128xf32, #tpu.memory_space<any>>) target(%107 : memref<1x128xf32, #tpu.memory_space<vmem>>) target_semaphore(%109 : memref<!tpu.dma_semaphore, #tpu.memory_space<semaphore_mem>>)
        %c6_i32 = arith.constant 6 : i32
        %110 = arith.addi %43, %c6_i32 : i32
        %111 = arith.addi %38, %110 : i32
        %112 = arith.index_cast %111 : i32 to index
        %113 = memref.load %arg2[%112] : memref<64xi32, #tpu.memory_space<smem>>
        %c0_i32_51 = arith.constant 0 : i32
        %c255_i32_52 = arith.constant 255 : i32
        %114 = arith.maxsi %c0_i32_51, %113 : i32
        %115 = arith.minsi %c255_i32_52, %114 : i32
        %c0_i32_53 = arith.constant 0 : i32
        %116 = tpu.memref_slice %arg4[%115, %c0_i32_53] : memref<256x128xf32, #tpu.memory_space<any>> -> memref<1x128xf32, #tpu.memory_space<any>>
        %c0_i32_54 = arith.constant 0 : i32
        %117 = tpu.memref_slice %arg8[%0, %110, %c0_i32_54] : memref<2x16x128xf32, #tpu.memory_space<vmem>> -> memref<1x1x128xf32, #tpu.memory_space<vmem>>
        %118 = tpu.memref_squeeze %117 : memref<1x1x128xf32, #tpu.memory_space<vmem>> -> memref<1x128xf32, #tpu.memory_space<vmem>>
        %119 = tpu.memref_slice %arg9[%0] : memref<2x!tpu.dma_semaphore, #tpu.memory_space<semaphore_mem>> -> memref<1x!tpu.dma_semaphore, #tpu.memory_space<semaphore_mem>>
        %120 = tpu.memref_squeeze %119 : memref<1x!tpu.dma_semaphore, #tpu.memory_space<semaphore_mem>> -> memref<!tpu.dma_semaphore, #tpu.memory_space<semaphore_mem>>
        tpu.enqueue_dma source(%116 : memref<1x128xf32, #tpu.memory_space<any>>) target(%118 : memref<1x128xf32, #tpu.memory_space<vmem>>) target_semaphore(%120 : memref<!tpu.dma_semaphore, #tpu.memory_space<semaphore_mem>>)
        %c7_i32 = arith.constant 7 : i32
        %121 = arith.addi %43, %c7_i32 : i32
        %122 = arith.addi %38, %121 : i32
        %123 = arith.index_cast %122 : i32 to index
        %124 = memref.load %arg2[%123] : memref<64xi32, #tpu.memory_space<smem>>
        %c0_i32_55 = arith.constant 0 : i32
        %c255_i32_56 = arith.constant 255 : i32
        %125 = arith.maxsi %c0_i32_55, %124 : i32
        %126 = arith.minsi %c255_i32_56, %125 : i32
        %c0_i32_57 = arith.constant 0 : i32
        %127 = tpu.memref_slice %arg4[%126, %c0_i32_57] : memref<256x128xf32, #tpu.memory_space<any>> -> memref<1x128xf32, #tpu.memory_space<any>>
        %c0_i32_58 = arith.constant 0 : i32
        %128 = tpu.memref_slice %arg8[%0, %121, %c0_i32_58] : memref<2x16x128xf32, #tpu.memory_space<vmem>> -> memref<1x1x128xf32, #tpu.memory_space<vmem>>
        %129 = tpu.memref_squeeze %128 : memref<1x1x128xf32, #tpu.memory_space<vmem>> -> memref<1x128xf32, #tpu.memory_space<vmem>>
        %130 = tpu.memref_slice %arg9[%0] : memref<2x!tpu.dma_semaphore, #tpu.memory_space<semaphore_mem>> -> memref<1x!tpu.dma_semaphore, #tpu.memory_space<semaphore_mem>>
        %131 = tpu.memref_squeeze %130 : memref<1x!tpu.dma_semaphore, #tpu.memory_space<semaphore_mem>> -> memref<!tpu.dma_semaphore, #tpu.memory_space<semaphore_mem>>
        tpu.enqueue_dma source(%127 : memref<1x128xf32, #tpu.memory_space<any>>) target(%129 : memref<1x128xf32, #tpu.memory_space<vmem>>) target_semaphore(%131 : memref<!tpu.dma_semaphore, #tpu.memory_space<semaphore_mem>>)
      }
      %c2_i32_22 = arith.constant 2 : i32
    } else {
    }
    %c1_i32_1 = arith.constant 1 : i32
    %4 = arith.addi %arg1, %c1_i32_1 : i32
    %c2_i32 = arith.constant 2 : i32
    %5 = arith.cmpi slt, %4, %c2_i32 : i32
    %6 = arith.extui %5 : i1 to i32
    %c0_i32_2 = arith.constant 0 : i32
    %7 = arith.cmpi ne, %6, %c0_i32_2 : i32
    scf.if %7 {
      %c1_i32_19 = arith.constant 1 : i32
      %36 = arith.addi %arg1, %c1_i32_19 : i32
      %c1_i32_20 = arith.constant 1 : i32
      %37 = arith.subi %c1_i32_20, %0 : i32
      %c32_i32 = arith.constant 32 : i32
      %38 = arith.muli %36, %c32_i32 : i32
      %c16_i32 = arith.constant 16 : i32
      %39 = arith.muli %arg0, %c16_i32 : i32
      %40 = arith.addi %38, %39 : i32
      %c0_i32_21 = arith.constant 0 : i32
      %c2_i32_22 = arith.constant 2 : i32
      %41 = arith.addi %c0_i32_21, %c2_i32_22 : i32
      %c1_i32_23 = arith.constant 1 : i32
      scf.for %arg10 = %c0_i32_21 to %41 step %c1_i32_23  : i32 {
        %c1_i32_25 = arith.constant 1 : i32
        %42 = arith.muli %arg10, %c1_i32_25 : i32
        %c0_i32_26 = arith.constant 0 : i32
        %43 = arith.addi %c0_i32_26, %42 : i32
        %c8_i32 = arith.constant 8 : i32
        %44 = arith.muli %43, %c8_i32 : i32
        %45 = tpu.assume_multiple %44, 8 : i32
        %c0_i32_27 = arith.constant 0 : i32
        %46 = arith.addi %45, %c0_i32_27 : i32
        %47 = arith.addi %40, %46 : i32
        %48 = arith.index_cast %47 : i32 to index
        %49 = memref.load %arg2[%48] : memref<64xi32, #tpu.memory_space<smem>>
        %c0_i32_28 = arith.constant 0 : i32
        %c255_i32 = arith.constant 255 : i32
        %50 = arith.maxsi %c0_i32_28, %49 : i32
        %51 = arith.minsi %c255_i32, %50 : i32
        %c0_i32_29 = arith.constant 0 : i32
        %52 = tpu.memref_slice %arg4[%51, %c0_i32_29] : memref<256x128xf32, #tpu.memory_space<any>> -> memref<1x128xf32, #tpu.memory_space<any>>
        %c0_i32_30 = arith.constant 0 : i32
        %53 = tpu.memref_slice %arg8[%37, %46, %c0_i32_30] : memref<2x16x128xf32, #tpu.memory_space<vmem>> -> memref<1x1x128xf32, #tpu.memory_space<vmem>>
        %54 = tpu.memref_squeeze %53 : memref<1x1x128xf32, #tpu.memory_space<vmem>> -> memref<1x128xf32, #tpu.memory_space<vmem>>
        %55 = tpu.memref_slice %arg9[%37] : memref<2x!tpu.dma_semaphore, #tpu.memory_space<semaphore_mem>> -> memref<1x!tpu.dma_semaphore, #tpu.memory_space<semaphore_mem>>
        %56 = tpu.memref_squeeze %55 : memref<1x!tpu.dma_semaphore, #tpu.memory_space<semaphore_mem>> -> memref<!tpu.dma_semaphore, #tpu.memory_space<semaphore_mem>>
        tpu.enqueue_dma source(%52 : memref<1x128xf32, #tpu.memory_space<any>>) target(%54 : memref<1x128xf32, #tpu.memory_space<vmem>>) target_semaphore(%56 : memref<!tpu.dma_semaphore, #tpu.memory_space<semaphore_mem>>)
        %c1_i32_31 = arith.constant 1 : i32
        %57 = arith.addi %45, %c1_i32_31 : i32
        %58 = arith.addi %40, %57 : i32
        %59 = arith.index_cast %58 : i32 to index
        %60 = memref.load %arg2[%59] : memref<64xi32, #tpu.memory_space<smem>>
        %c0_i32_32 = arith.constant 0 : i32
        %c255_i32_33 = arith.constant 255 : i32
        %61 = arith.maxsi %c0_i32_32, %60 : i32
        %62 = arith.minsi %c255_i32_33, %61 : i32
        %c0_i32_34 = arith.constant 0 : i32
        %63 = tpu.memref_slice %arg4[%62, %c0_i32_34] : memref<256x128xf32, #tpu.memory_space<any>> -> memref<1x128xf32, #tpu.memory_space<any>>
        %c0_i32_35 = arith.constant 0 : i32
        %64 = tpu.memref_slice %arg8[%37, %57, %c0_i32_35] : memref<2x16x128xf32, #tpu.memory_space<vmem>> -> memref<1x1x128xf32, #tpu.memory_space<vmem>>
        %65 = tpu.memref_squeeze %64 : memref<1x1x128xf32, #tpu.memory_space<vmem>> -> memref<1x128xf32, #tpu.memory_space<vmem>>
        %66 = tpu.memref_slice %arg9[%37] : memref<2x!tpu.dma_semaphore, #tpu.memory_space<semaphore_mem>> -> memref<1x!tpu.dma_semaphore, #tpu.memory_space<semaphore_mem>>
        %67 = tpu.memref_squeeze %66 : memref<1x!tpu.dma_semaphore, #tpu.memory_space<semaphore_mem>> -> memref<!tpu.dma_semaphore, #tpu.memory_space<semaphore_mem>>
        tpu.enqueue_dma source(%63 : memref<1x128xf32, #tpu.memory_space<any>>) target(%65 : memref<1x128xf32, #tpu.memory_space<vmem>>) target_semaphore(%67 : memref<!tpu.dma_semaphore, #tpu.memory_space<semaphore_mem>>)
        %c2_i32_36 = arith.constant 2 : i32
        %68 = arith.addi %45, %c2_i32_36 : i32
        %69 = arith.addi %40, %68 : i32
        %70 = arith.index_cast %69 : i32 to index
        %71 = memref.load %arg2[%70] : memref<64xi32, #tpu.memory_space<smem>>
        %c0_i32_37 = arith.constant 0 : i32
        %c255_i32_38 = arith.constant 255 : i32
        %72 = arith.maxsi %c0_i32_37, %71 : i32
        %73 = arith.minsi %c255_i32_38, %72 : i32
        %c0_i32_39 = arith.constant 0 : i32
        %74 = tpu.memref_slice %arg4[%73, %c0_i32_39] : memref<256x128xf32, #tpu.memory_space<any>> -> memref<1x128xf32, #tpu.memory_space<any>>
        %c0_i32_40 = arith.constant 0 : i32
        %75 = tpu.memref_slice %arg8[%37, %68, %c0_i32_40] : memref<2x16x128xf32, #tpu.memory_space<vmem>> -> memref<1x1x128xf32, #tpu.memory_space<vmem>>
        %76 = tpu.memref_squeeze %75 : memref<1x1x128xf32, #tpu.memory_space<vmem>> -> memref<1x128xf32, #tpu.memory_space<vmem>>
        %77 = tpu.memref_slice %arg9[%37] : memref<2x!tpu.dma_semaphore, #tpu.memory_space<semaphore_mem>> -> memref<1x!tpu.dma_semaphore, #tpu.memory_space<semaphore_mem>>
        %78 = tpu.memref_squeeze %77 : memref<1x!tpu.dma_semaphore, #tpu.memory_space<semaphore_mem>> -> memref<!tpu.dma_semaphore, #tpu.memory_space<semaphore_mem>>
        tpu.enqueue_dma source(%74 : memref<1x128xf32, #tpu.memory_space<any>>) target(%76 : memref<1x128xf32, #tpu.memory_space<vmem>>) target_semaphore(%78 : memref<!tpu.dma_semaphore, #tpu.memory_space<semaphore_mem>>)
        %c3_i32 = arith.constant 3 : i32
        %79 = arith.addi %45, %c3_i32 : i32
        %80 = arith.addi %40, %79 : i32
        %81 = arith.index_cast %80 : i32 to index
        %82 = memref.load %arg2[%81] : memref<64xi32, #tpu.memory_space<smem>>
        %c0_i32_41 = arith.constant 0 : i32
        %c255_i32_42 = arith.constant 255 : i32
        %83 = arith.maxsi %c0_i32_41, %82 : i32
        %84 = arith.minsi %c255_i32_42, %83 : i32
        %c0_i32_43 = arith.constant 0 : i32
        %85 = tpu.memref_slice %arg4[%84, %c0_i32_43] : memref<256x128xf32, #tpu.memory_space<any>> -> memref<1x128xf32, #tpu.memory_space<any>>
        %c0_i32_44 = arith.constant 0 : i32
        %86 = tpu.memref_slice %arg8[%37, %79, %c0_i32_44] : memref<2x16x128xf32, #tpu.memory_space<vmem>> -> memref<1x1x128xf32, #tpu.memory_space<vmem>>
        %87 = tpu.memref_squeeze %86 : memref<1x1x128xf32, #tpu.memory_space<vmem>> -> memref<1x128xf32, #tpu.memory_space<vmem>>
        %88 = tpu.memref_slice %arg9[%37] : memref<2x!tpu.dma_semaphore, #tpu.memory_space<semaphore_mem>> -> memref<1x!tpu.dma_semaphore, #tpu.memory_space<semaphore_mem>>
        %89 = tpu.memref_squeeze %88 : memref<1x!tpu.dma_semaphore, #tpu.memory_space<semaphore_mem>> -> memref<!tpu.dma_semaphore, #tpu.memory_space<semaphore_mem>>
        tpu.enqueue_dma source(%85 : memref<1x128xf32, #tpu.memory_space<any>>) target(%87 : memref<1x128xf32, #tpu.memory_space<vmem>>) target_semaphore(%89 : memref<!tpu.dma_semaphore, #tpu.memory_space<semaphore_mem>>)
        %c4_i32 = arith.constant 4 : i32
        %90 = arith.addi %45, %c4_i32 : i32
        %91 = arith.addi %40, %90 : i32
        %92 = arith.index_cast %91 : i32 to index
        %93 = memref.load %arg2[%92] : memref<64xi32, #tpu.memory_space<smem>>
        %c0_i32_45 = arith.constant 0 : i32
        %c255_i32_46 = arith.constant 255 : i32
        %94 = arith.maxsi %c0_i32_45, %93 : i32
        %95 = arith.minsi %c255_i32_46, %94 : i32
        %c0_i32_47 = arith.constant 0 : i32
        %96 = tpu.memref_slice %arg4[%95, %c0_i32_47] : memref<256x128xf32, #tpu.memory_space<any>> -> memref<1x128xf32, #tpu.memory_space<any>>
        %c0_i32_48 = arith.constant 0 : i32
        %97 = tpu.memref_slice %arg8[%37, %90, %c0_i32_48] : memref<2x16x128xf32, #tpu.memory_space<vmem>> -> memref<1x1x128xf32, #tpu.memory_space<vmem>>
        %98 = tpu.memref_squeeze %97 : memref<1x1x128xf32, #tpu.memory_space<vmem>> -> memref<1x128xf32, #tpu.memory_space<vmem>>
        %99 = tpu.memref_slice %arg9[%37] : memref<2x!tpu.dma_semaphore, #tpu.memory_space<semaphore_mem>> -> memref<1x!tpu.dma_semaphore, #tpu.memory_space<semaphore_mem>>
        %100 = tpu.memref_squeeze %99 : memref<1x!tpu.dma_semaphore, #tpu.memory_space<semaphore_mem>> -> memref<!tpu.dma_semaphore, #tpu.memory_space<semaphore_mem>>
        tpu.enqueue_dma source(%96 : memref<1x128xf32, #tpu.memory_space<any>>) target(%98 : memref<1x128xf32, #tpu.memory_space<vmem>>) target_semaphore(%100 : memref<!tpu.dma_semaphore, #tpu.memory_space<semaphore_mem>>)
        %c5_i32 = arith.constant 5 : i32
        %101 = arith.addi %45, %c5_i32 : i32
        %102 = arith.addi %40, %101 : i32
        %103 = arith.index_cast %102 : i32 to index
        %104 = memref.load %arg2[%103] : memref<64xi32, #tpu.memory_space<smem>>
        %c0_i32_49 = arith.constant 0 : i32
        %c255_i32_50 = arith.constant 255 : i32
        %105 = arith.maxsi %c0_i32_49, %104 : i32
        %106 = arith.minsi %c255_i32_50, %105 : i32
        %c0_i32_51 = arith.constant 0 : i32
        %107 = tpu.memref_slice %arg4[%106, %c0_i32_51] : memref<256x128xf32, #tpu.memory_space<any>> -> memref<1x128xf32, #tpu.memory_space<any>>
        %c0_i32_52 = arith.constant 0 : i32
        %108 = tpu.memref_slice %arg8[%37, %101, %c0_i32_52] : memref<2x16x128xf32, #tpu.memory_space<vmem>> -> memref<1x1x128xf32, #tpu.memory_space<vmem>>
        %109 = tpu.memref_squeeze %108 : memref<1x1x128xf32, #tpu.memory_space<vmem>> -> memref<1x128xf32, #tpu.memory_space<vmem>>
        %110 = tpu.memref_slice %arg9[%37] : memref<2x!tpu.dma_semaphore, #tpu.memory_space<semaphore_mem>> -> memref<1x!tpu.dma_semaphore, #tpu.memory_space<semaphore_mem>>
        %111 = tpu.memref_squeeze %110 : memref<1x!tpu.dma_semaphore, #tpu.memory_space<semaphore_mem>> -> memref<!tpu.dma_semaphore, #tpu.memory_space<semaphore_mem>>
        tpu.enqueue_dma source(%107 : memref<1x128xf32, #tpu.memory_space<any>>) target(%109 : memref<1x128xf32, #tpu.memory_space<vmem>>) target_semaphore(%111 : memref<!tpu.dma_semaphore, #tpu.memory_space<semaphore_mem>>)
        %c6_i32 = arith.constant 6 : i32
        %112 = arith.addi %45, %c6_i32 : i32
        %113 = arith.addi %40, %112 : i32
        %114 = arith.index_cast %113 : i32 to index
        %115 = memref.load %arg2[%114] : memref<64xi32, #tpu.memory_space<smem>>
        %c0_i32_53 = arith.constant 0 : i32
        %c255_i32_54 = arith.constant 255 : i32
        %116 = arith.maxsi %c0_i32_53, %115 : i32
        %117 = arith.minsi %c255_i32_54, %116 : i32
        %c0_i32_55 = arith.constant 0 : i32
        %118 = tpu.memref_slice %arg4[%117, %c0_i32_55] : memref<256x128xf32, #tpu.memory_space<any>> -> memref<1x128xf32, #tpu.memory_space<any>>
        %c0_i32_56 = arith.constant 0 : i32
        %119 = tpu.memref_slice %arg8[%37, %112, %c0_i32_56] : memref<2x16x128xf32, #tpu.memory_space<vmem>> -> memref<1x1x128xf32, #tpu.memory_space<vmem>>
        %120 = tpu.memref_squeeze %119 : memref<1x1x128xf32, #tpu.memory_space<vmem>> -> memref<1x128xf32, #tpu.memory_space<vmem>>
        %121 = tpu.memref_slice %arg9[%37] : memref<2x!tpu.dma_semaphore, #tpu.memory_space<semaphore_mem>> -> memref<1x!tpu.dma_semaphore, #tpu.memory_space<semaphore_mem>>
        %122 = tpu.memref_squeeze %121 : memref<1x!tpu.dma_semaphore, #tpu.memory_space<semaphore_mem>> -> memref<!tpu.dma_semaphore, #tpu.memory_space<semaphore_mem>>
        tpu.enqueue_dma source(%118 : memref<1x128xf32, #tpu.memory_space<any>>) target(%120 : memref<1x128xf32, #tpu.memory_space<vmem>>) target_semaphore(%122 : memref<!tpu.dma_semaphore, #tpu.memory_space<semaphore_mem>>)
        %c7_i32 = arith.constant 7 : i32
        %123 = arith.addi %45, %c7_i32 : i32
        %124 = arith.addi %40, %123 : i32
        %125 = arith.index_cast %124 : i32 to index
        %126 = memref.load %arg2[%125] : memref<64xi32, #tpu.memory_space<smem>>
        %c0_i32_57 = arith.constant 0 : i32
        %c255_i32_58 = arith.constant 255 : i32
        %127 = arith.maxsi %c0_i32_57, %126 : i32
        %128 = arith.minsi %c255_i32_58, %127 : i32
        %c0_i32_59 = arith.constant 0 : i32
        %129 = tpu.memref_slice %arg4[%128, %c0_i32_59] : memref<256x128xf32, #tpu.memory_space<any>> -> memref<1x128xf32, #tpu.memory_space<any>>
        %c0_i32_60 = arith.constant 0 : i32
        %130 = tpu.memref_slice %arg8[%37, %123, %c0_i32_60] : memref<2x16x128xf32, #tpu.memory_space<vmem>> -> memref<1x1x128xf32, #tpu.memory_space<vmem>>
        %131 = tpu.memref_squeeze %130 : memref<1x1x128xf32, #tpu.memory_space<vmem>> -> memref<1x128xf32, #tpu.memory_space<vmem>>
        %132 = tpu.memref_slice %arg9[%37] : memref<2x!tpu.dma_semaphore, #tpu.memory_space<semaphore_mem>> -> memref<1x!tpu.dma_semaphore, #tpu.memory_space<semaphore_mem>>
        %133 = tpu.memref_squeeze %132 : memref<1x!tpu.dma_semaphore, #tpu.memory_space<semaphore_mem>> -> memref<!tpu.dma_semaphore, #tpu.memory_space<semaphore_mem>>
        tpu.enqueue_dma source(%129 : memref<1x128xf32, #tpu.memory_space<any>>) target(%131 : memref<1x128xf32, #tpu.memory_space<vmem>>) target_semaphore(%133 : memref<!tpu.dma_semaphore, #tpu.memory_space<semaphore_mem>>)
      }
      %c2_i32_24 = arith.constant 2 : i32
    } else {
    }
    %c0_i32_3 = arith.constant 0 : i32
    %c0_i32_4 = arith.constant 0 : i32
    %8 = tpu.memref_slice %arg4[%c0_i32_3, %c0_i32_4] : memref<256x128xf32, #tpu.memory_space<any>> -> memref<16x128xf32, #tpu.memory_space<any>>
    %c0_i32_5 = arith.constant 0 : i32
    %c0_i32_6 = arith.constant 0 : i32
    %9 = tpu.memref_slice %arg8[%0, %c0_i32_5, %c0_i32_6] : memref<2x16x128xf32, #tpu.memory_space<vmem>> -> memref<1x16x128xf32, #tpu.memory_space<vmem>>
    %10 = tpu.memref_squeeze %9 : memref<1x16x128xf32, #tpu.memory_space<vmem>> -> memref<16x128xf32, #tpu.memory_space<vmem>>
    %11 = tpu.memref_slice %arg9[%0] : memref<2x!tpu.dma_semaphore, #tpu.memory_space<semaphore_mem>> -> memref<1x!tpu.dma_semaphore, #tpu.memory_space<semaphore_mem>>
    %12 = tpu.memref_squeeze %11 : memref<1x!tpu.dma_semaphore, #tpu.memory_space<semaphore_mem>> -> memref<!tpu.dma_semaphore, #tpu.memory_space<semaphore_mem>>
    tpu.wait_dma2 semaphore(%12 : memref<!tpu.dma_semaphore, #tpu.memory_space<semaphore_mem>>) src(%8 : memref<16x128xf32, #tpu.memory_space<any>>) dst(%10 : memref<16x128xf32, #tpu.memory_space<vmem>>)
    %13 = arith.index_cast %0 : i32 to index
    %c0 = arith.constant 0 : index
    %c0_7 = arith.constant 0 : index
    %14 = vector.load %arg8[%13, %c0, %c0_7] : memref<2x16x128xf32, #tpu.memory_space<vmem>>, vector<1x16x128xf32>
    %15 = vector.shape_cast %14 : vector<1x16x128xf32> to vector<16x128xf32>
    %c0_8 = arith.constant 0 : index
    %c0_9 = arith.constant 0 : index
    %c0_10 = arith.constant 0 : index
    %16 = vector.load %arg3[%c0_8, %c0_9, %c0_10] : memref<1x16x1xi32, #tpu.memory_space<vmem>>, vector<1x16x1xi32>
    %17 = vector.shape_cast %16 : vector<1x16x1xi32> to vector<16x1xi32>
    %c0_11 = arith.constant 0 : index
    %c0_12 = arith.constant 0 : index
    %18 = vector.load %arg5[%c0_11, %c0_12] : memref<2x128xf32, #tpu.memory_space<vmem>>, vector<2x128xf32>
    %19 = vector.extract_strided_slice %18 {offsets = [0, 0], sizes = [1, 128], strides = [1, 1]} : vector<2x128xf32> to vector<1x128xf32>
    %20 = vector.shape_cast %19 : vector<1x128xf32> to vector<1x128xf32>
    %21 = vector.broadcast %20 : vector<1x128xf32> to vector<16x128xf32>
    %c1_i32_13 = arith.constant 1 : i32
    %22 = vector.broadcast %c1_i32_13 : i32 to vector<16x1xi32>
    %23 = arith.cmpi eq, %17, %22 : vector<16x1xi32>
    %24 = vector.extract_strided_slice %18 {offsets = [1, 0], sizes = [1, 128], strides = [1, 1]} : vector<2x128xf32> to vector<1x128xf32>
    %25 = vector.shape_cast %23 : vector<16x1xi1> to vector<16x1xi1>
    %26 = vector.broadcast %25 : vector<16x1xi1> to vector<16x128xi1>
    %27 = vector.shape_cast %24 : vector<1x128xf32> to vector<1x128xf32>
    %28 = vector.broadcast %27 : vector<1x128xf32> to vector<16x128xf32>
    %29 = arith.select %26, %28, %21 : vector<16x128xi1>, vector<16x128xf32>
    %30 = arith.addf %15, %29 : vector<16x128xf32>
    %c0_14 = arith.constant 0 : index
    %c0_15 = arith.constant 0 : index
    %31 = vector.load %arg6[%c0_14, %c0_15] : memref<16x128xf32, #tpu.memory_space<vmem>>, vector<16x128xf32>
    %32 = arith.addf %30, %31 : vector<16x128xf32>
    %c0_16 = arith.constant 0 : index
    %c0_17 = arith.constant 0 : index
    %c0_18 = arith.constant 0 : index
    %33 = vector.load %arg7[%c0_16, %c0_17, %c0_18] : memref<1x16x128xf32, #tpu.memory_space<vmem>>, vector<1x16x128xf32>
    %34 = vector.shape_cast %33 : vector<1x16x128xf32> to vector<16x128xf32>
    %35 = vector.shape_cast %32 : vector<16x128xf32> to vector<1x16x128xf32>
    tpu.vector_store %arg7[%c0_16, %c0_17, %c0_18], %35 {strides = array<i32>} : memref<1x16x128xf32, #tpu.memory_space<vmem>>, vector<1x16x128xf32>,
    return
  }
  func.func @transform_0(%arg0: i32, %arg1: i32, %arg2: memref<64xi32, #tpu.memory_space<smem>>) -> (i32, i32, i32) {
    %c0_i32 = arith.constant 0 : i32
    %c0_i32_0 = arith.constant 0 : i32
    return %arg1, %arg0, %c0_i32 : i32, i32, i32
  }
  func.func @transform_2(%arg0: i32, %arg1: i32, %arg2: memref<64xi32, #tpu.memory_space<smem>>) -> (i32, i32) {
    %c0_i32 = arith.constant 0 : i32
    %c0_i32_0 = arith.constant 0 : i32
    %c0_i32_1 = arith.constant 0 : i32
    return %c0_i32, %c0_i32_0 : i32, i32
  }
  func.func @transform_3(%arg0: i32, %arg1: i32, %arg2: memref<64xi32, #tpu.memory_space<smem>>) -> (i32, i32) {
    %c0_i32 = arith.constant 0 : i32
    %c0_i32_0 = arith.constant 0 : i32
    return %arg0, %c0_i32 : i32, i32
  }
  func.func @transform_4(%arg0: i32, %arg1: i32, %arg2: memref<64xi32, #tpu.memory_space<smem>>) -> (i32, i32, i32) {
    %c0_i32 = arith.constant 0 : i32
    %c0_i32_0 = arith.constant 0 : i32
    return %arg1, %arg0, %c0_i32 : i32, i32, i32
  }
}

</mosaic_0001>

<bundles_post_ra>
// kernel: tpu_custom_call.1
= control target key start
LH: loop header
LB: loop body
LE: loop exit
PB: predicated region body
PF: predicated region fallthrough
CT: control target
= control target key end

     0   :  { %s2338_s0 = inlined_call_operand.vmem [shape: s32[64], index: 0, kind: input, shape index: {}]   ;;  %s2339_s1 = inlined_call_operand.vmem [shape: s32[2,32,1], index: 1, kind: input, shape index: {}]   ;;  %s2340_s2 = inlined_call_operand.hbm [shape: f32[256,128], index: 2, kind: input, shape index: {}]   ;;  %s2341_s3 = inlined_call_operand.vmem [shape: f32[2,128], index: 3, kind: input, shape index: {}]   ;;  %s2342_s4 = inlined_call_operand.vmem [shape: f32[32,128], index: 4, kind: input, shape index: {}]   ;;  %s2343_s5 = inlined_call_operand.hbm [shape: f32[2,32,128], index: 5, kind: output, shape index: {}]  }
   0x1   :  { %2361 = sst [smem:[#allocation58_spill]] %s2339_s1  ;;  %s10_s20 = sshll.u32 %s2338_s0, 4  ;;  %s11_s20 = int_to_ptr.vmem [resolvable:$true] %s10_s20 }
   0x2   :  { %2362 = sst [smem:[#allocation59_spill]] %s2341_s3  ;;  %s1184_s21 = scalar_lea.vmem %s11_s20, 16 }
   0x3   :  { %2363 = sst [smem:[#allocation60_spill]] %s2342_s4  ;;  %p1185_p0 = scmp.ne.s32.totalorder %s11_s20, %s1184_s21 }
   0x4   :  { %2364 = sst [smem:[#allocation61_spill]] %s2343_s5  ;;  %p1189_p1 = scmp.lt.s32.totalorder %s11_s20, %s11_s20 }
   0x5   :  { %p1190_p2 = scmp.lt.s32.totalorder %s1184_s21, %s1184_s21 }
   0x7   :  { %p1191_p3 = por %p1190_p2, %p1189_p1 }
   0x9   :  { %p1192_p4 = pnand %p1191_p3, %p1185_p0 }
   0xb   :  { %1195 = shalt.err (!%p1192_p4)  }
   0xc   :  { %s1696_s22 = smov [#allocation5]  }
   0xd   :  { %13 = dma.vmem_to_smem %s11_s20, 16, %s1696_s22, [#allocation4] }
   0xe   :  { %1648 = dma.done.wait [#allocation4], 16 }
   0xf   :  { %1649 = vsyncadd [#allocation4], 4294967280 }
  0x10   :  { %15 = sfence }
  0x11   :  { %16 = vsyncpa [#allocation7], 0 }
  0x12   :  { %18 = vsyncpa [#allocation7 + $0x1], 0  ;;  %s1736_s23 = smov 0   ;;  %s1738_s24 = smov 0  }
  0x13   :  { %s1740_s0 = smov 0   ;;  %s1742_s25 = smov 0  }
  0x14   :  { %s1744_s26 = smov 0   ;;  %s1746_s27 = smov 0  }
  0x15   :  { %s1748_s28 = smov 0   ;;  %s1750_s29 = smov 0  }
  0x16 LB: > { %2365 = sst [smem:[#allocation45_spill]] %s1658_s23  ;;  %s904_s30 = sadd.s32 4294967295, %s1686_s29   ;;  %s1686_s29 = sphi %s1750_s29, %s24_s29   ;;  %s1682_s28 = sphi %s1748_s28, %s2405_s28   ;;  %s1678_s27 = sphi %s1746_s27, %s2404_s27   ;;  %s1674_s26 = sphi %s1744_s26, %s2403_s26   ;;  %s1670_s25 = sphi %s1742_s25, %s2402_s25   ;;  %s1666_s0 = sphi %s1740_s0, %s2401_s0   ;;  %s1662_s24 = sphi %s1738_s24, %s2400_s24   ;;  %s1658_s23 = sphi %s1736_s23, %s2399_s23  }
  0x17   : > { %2366 = sst [smem:[#allocation46_spill]] %s1662_s24  ;;  %s905_s6 = sadd.s32 4294967294, %s1686_s29  }
  0x18   : > { %2367 = sst [smem:[#allocation47_spill]] %s1666_s0  ;;  %s33_s7 = sadd.s32 1, %s1678_s27 }
  0x19   : > { %2368 = sst [smem:[#allocation48_spill]] %s1678_s27  ;;  %p34_p5 = scmp.ge.s32.totalorder %s33_s7, 2 }
  0x1a   : > { %2369 = sst [smem:[#allocation49_spill]] %s1682_s28  ;;  %s36_s8 = sadd.s32 1, %s1682_s28 }
  0x1b   : > { %2370 = sst [smem:[#allocation50_spill]] %s1686_s29  ;;  %p130_p6 = scmp.ne.s32.totalorder %s1666_s0, %s1662_s24 }
  0x1c   : > { %p131_p7 = scmp.eq.s32.totalorder %s904_s30, 3  ;;  %s2407_s7 = smov (%p34_p5, %s33_s7), 0 }
  0x1d   : > { %2371 = sst [smem:[#allocation51_spill]] %s2407_s7  ;;  %s2409_s8 = smov (!%p34_p5, %s36_s8), %s1682_s28 }
  0x1e   : > { %s115_s9 = ssub.s32 %s1678_s27, %s2407_s7  ;;  %p1787_p8 = por %p131_p7, %p130_p6 }
  0x1f   : > { %p38_p9 = scmp.ge.s32.totalorder %s2409_s8, 2  ;;  %p136_p10 = scmp.ne.s32.totalorder %s1662_s24, %s1658_s23 }
  0x20   : > { %s2372_s10 = scalar_select %p1787_p8, 1, 0 }
  0x21   : > { %p137_p11 = scmp.eq.s32.totalorder %s905_s6, 3  ;;  %p908_p12 = scmp.ge.s32.totalorder %s1686_s29, 1 }
  0x22   : > { %2373 = sst [smem:[#allocation52_spill]] %s2372_s10  ;;  %s2411_s8 = smov (%p38_p9, %s2409_s8), 0 }
  0x23   : > { %2374 = sst [smem:[#allocation53_spill]] %s2411_s8  ;;  %p1796_p13 = por %p137_p11, %p136_p10 }
  0x24   : > { %p180_p0 = scmp.lt.s32.totalorder %s1686_s29, 5  ;;  %s116_s12 = ssub.s32 %s1682_s28, %s2411_s8 }
  0x25   : > { %s2375_s11 = scalar_select %p1796_p13, 1, 0 }
  0x26   : > { %s120_s13 = sadd.s32 1, %s1666_s0  ;;  %s117_s14 = sor.u32 %s116_s12, %s115_s9 }
  0x27   : > { %2376 = sst [smem:[#allocation54_spill]] %s2375_s11  ;;  %p181_p1 = pnand %p908_p12, %p180_p0 }
  0x28   : > { %p118_p2 = scmp.eq.s32.totalorder %s117_s14, 0 }
  0x29   : > { %184 = sbr.rel (%p181_p1) target bundleno = 680 (0x2a8), region = 32 }
  0x2a   : > { %s1805_s15 = scalar_select %p118_p2, %s1666_s0, %s120_s13  }
  0x2c   : > { %2377 = sst [smem:[#allocation55_spill]] %s1805_s15 }
  0x30   : > { %s2347_s16 = sand.u32 1, %s1662_s24   ;;  %s1809_s17 = sshll.u32 %s1674_s26, 1 }
  0x31   : > { %2378 = sst [smem:[#allocation56_spill]] %s1809_s17  ;;  %s909_s18 = sshll.u32 %s2347_s16, 4 }
  0x32   : > { %p214_p3 = scmp.lt.s32.totalorder %s1670_s25, 1  ;;  %p216_p4 = scmp.lt.s32.totalorder %s1809_s17, 3 }
  0x33   : > { %s1818_s22 = sand.u32 1, %s1670_s25  ;;  %s2379_s4 = sld [smem:[#allocation60_spill]] }
  0x34   : > { %s215_s19 = scalar_select %p214_p3, %s1670_s25, 1 }
  0x35   : > { %s217_s20 = scalar_select %p216_p4, %s1809_s17, 3 }
  0x36   : > { %s911_s21 = sshll.u32 %s215_s19, 2  ;;  %s2380_s1 = sld [smem:[#allocation58_spill]] }
  0x37   : > { %s219_s30 = sadd.s32 %s911_s21, %s217_s20  ;;  %s914_s6 = sshll.u32 %s217_s20, 3 }
  0x38   : > { %s912_s9 = sshll.u32 %s219_s30, 3  ;;  %s1830_s16 = scalar_lea.vmem [#allocation6], %s909_s18 }
  0x39   : > { %s1823_s14 = scalar_lea.vmem %s2379_s4, %s914_s6  ;;  %2381 = sst [smem:[#allocation57_spill]] %s1830_s16 }
  0x3a   : > { %p915_p5 = scmp.ne.s32.totalorder %s1670_s25, 0 }
  0x3b   : > { %s916_s19 = sshll.u32 (!%p915_p5), %s1670_s25, 5  ;;  %s917_s20 = sshll.u32 (!%p915_p5), %s1674_s26, 4 }
  0x3c   : > { %s1828_s28 = scalar_lea.vmem %s2380_s1, %s912_s9  ;;  %234 = sbr.rel (%p915_p5) target bundleno = 291 (0x123), region = 36 }
  0x3d   : > { %s1835_s21 = sadd.s32 (!%p915_p5), %s917_s20, %s916_s19  ;;  %s1837_s30 = smov (!%p915_p5), 0  }
  0x43 LB: >> { %s925_s7 = sshll.u32 %s1818_s22, 4  ;;  %s1844_s8 = sshll.u32 %s1690_s30, 3  ;;  %s1690_s30 = sphi %s1837_s30, %s243_s30  }
  0x44   : >> { %s245_s18 = sadd.s32 %s1844_s8, %s1835_s21  ;;  %s254_s6 = sadd.s32 %s925_s7, %s1844_s8 }
  0x45   : >> { %s246_s9 = sld [smem:[#allocation5 + %s245_s18]]  ;;  %s1849_s12 = scalar_lea.vmem [#allocation2], %s254_s6 }
  0x46   : >> { %s264_s13 = sshll.u32 %s1849_s12, 4  ;;  %s268_s19 = sadd.s32 1, %s1844_s8  ;;  %s1853_s13 = int_to_ptr.vmem [resolvable:$true] %s264_s13 }
  0x47   : >> { %s269_s20 = sadd.s32 %s268_s19, %s1835_s21  ;;  %s743_s4 = scalar_lea.vmem %s1849_s12, 1 [#allocation2] }
  0x48   : >> { %s1856_s1 = sld [smem:[#allocation5 + %s269_s20]]  ;;  %s286_s27 = sshll.u32 %s743_s4, 4  ;;  %s1860_s27 = int_to_ptr.vmem [resolvable:$true] %s286_s27 }
  0x49   : >> { %s290_s15 = sadd.s32 2, %s1844_s8  ;;  %s750_s6 = scalar_lea.vmem %s1849_s12, 2 [#allocation2] }
  0x4a   : >> { %s291_s7 = sadd.s32 %s290_s15, %s1835_s21  ;;  %s1871_s0 = sshll.u32 %s750_s6, 4  ;;  %s1912_s0 = int_to_ptr.vmem [resolvable:$true] %s1871_s0 }
  0x4b   : >> { %p247_p6 = scmp.gt.s32.totalorder %s246_s9, 0  ;;  %p919_p7 = scmp.lt.s32.totalorder %s246_s9, 255 }
  0x4c   : >> { %s1863_s18 = sld [smem:[#allocation5 + %s291_s7]]  ;;  %s1878_s15 = scalar_lea.sflag [#allocation3], %s1818_s22 }
  0x4d   : >> { %s2413_s9 = smov (!%p247_p6, %s246_s9), 0  ;;  %s1883_s10 = scalar_lea.hbm %s2340_s2, 4096 }
  0x4e   : >> { %p271_p9 = scmp.gt.s32.totalorder %s1856_s1, 0  ;;  %p926_p10 = scmp.lt.s32.totalorder %s1856_s1, 255 }
  0x4f   : >> { %s2415_s9 = smov (!%p919_p7, %s2413_s9), 255 }
  0x50   : >> { %s1869_s19 = scalar_select %p271_p9, %s1856_s1, 0 }
  0x51   : >> { %s924_s20 = sshll.u32 %s2415_s9, 4 }
  0x52   : >> { %s252_s23 = scalar_lea.hbm %s2340_s2, %s924_s20  ;;  %p293_p11 = scmp.gt.s32.totalorder %s1863_s18, 0 }
  0x53   : >> { %s1196_s7 = scalar_lea.hbm %s252_s23, 16  ;;  %p1199_p0 = scmp.lt.u32.totalorder %s252_s23, %s2340_s2 }
  0x54   : >> { %p1197_p12 = scmp.ne.s32.totalorder %s252_s23, %s1196_s7  ;;  %p1200_p1 = scmp.lt.u32.totalorder %s1883_s10, %s1196_s7 }
  0x55   : >> { %p1202_p3 = scmp.lt.u32.totalorder %s1196_s7, %s252_s23 }
  0x56   : >> { %p1201_p2 = por %p1200_p1, %p1199_p0 }
  0x58   : >> { %p1203_p4 = por %p1202_p3, %p1201_p2 }
  0x5a   : >> { %p1204_p5 = pnand %p1203_p4, %p1197_p12 }
  0x5c   : >> { %1207 = shalt.err (!%p1204_p5)  }
  0x5d   : >> { %s1208_s11 = scalar_lea.vmem %s1853_s13, 16  ;;  %s1697_s9 = smov [#allocation2]  }
  0x5e   : >> { %p1209_p6 = scmp.ne.s32.totalorder %s1853_s13, %s1208_s11  ;;  %s1210_s5 = sshll.u32 %s1697_s9, 4  ;;  %s1891_s5 = int_to_ptr.vmem [resolvable:$false] %s1210_s5 }
  0x5f   : >> { %s1894_s24 = scalar_lea.vmem %s1891_s5, 512  ;;  %p1213_p7 = scmp.lt.s32.totalorder %s1853_s13, %s1891_s5 }
  0x60   : >> { %p1214_p9 = scmp.lt.s32.totalorder %s1894_s24, %s1208_s11 }
  0x62   : >> { %p1215_p0 = por %p1214_p9, %p1213_p7 }
  0x64   : >> { %p1216_p1 = pnand %p1215_p0, %p1209_p6 }
  0x66   : >> { %1219 = shalt.err (!%p1216_p1)  }
  0x67   : >> { %267 = dma.hbm_to_vmem [thread:$0]  %s252_s23, 16, %s1853_s13, %s1878_s15 }
  0x68   : >> { %s2417_s19 = smov (!%p926_p10, %s1869_s19), 255 }
  0x69   : >> { %s294_s29 = scalar_select %p293_p11, %s1863_s18, 0 }
  0x6a   : >> { %s931_s16 = sshll.u32 %s2417_s19, 4 }
  0x6b   : >> { %s276_s4 = scalar_lea.hbm %s2340_s2, %s931_s16 }
  0x6c   : >> { %s1220_s7 = scalar_lea.hbm %s276_s4, 16  ;;  %p1223_p3 = scmp.lt.u32.totalorder %s276_s4, %s2340_s2 }
  0x6d   : >> { %p1221_p2 = scmp.ne.s32.totalorder %s276_s4, %s1220_s7  ;;  %p1224_p4 = scmp.lt.u32.totalorder %s1883_s10, %s1220_s7 }
  0x6e   : >> { %p1226_p6 = scmp.lt.u32.totalorder %s1220_s7, %s276_s4 }
  0x6f   : >> { %p1225_p5 = por %p1224_p4, %p1223_p3 }
  0x71   : >> { %p1227_p10 = por %p1226_p6, %p1225_p5 }
  0x73   : >> { %p1228_p7 = pnand %p1227_p10, %p1221_p2 }
  0x75   : >> { %1231 = shalt.err (!%p1228_p7)  }
  0x76   : >> { %s1232_s1 = scalar_lea.vmem %s1860_s27, 16  ;;  %p1237_p9 = scmp.lt.s32.totalorder %s1860_s27, %s1891_s5 }
  0x77   : >> { %p1233_p11 = scmp.ne.s32.totalorder %s1860_s27, %s1232_s1  ;;  %p1238_p0 = scmp.lt.s32.totalorder %s1894_s24, %s1232_s1 }
  0x79   : >> { %p1239_p1 = por %p1238_p0, %p1237_p9 }
  0x7b   : >> { %p1240_p12 = pnand %p1239_p1, %p1233_p11 }
  0x7d   : >> { %1243 = shalt.err (!%p1240_p12)  }
  0x7e   : >> { %289 = dma.hbm_to_vmem [thread:$0]  %s276_s4, 16, %s1860_s27, %s1878_s15 }
  0x7f   : >> { %p2382_p2 = scmp.lt.s32.totalorder %s1863_s18, 255  ;;  %s312_s23 = sadd.s32 3, %s1844_s8 }
  0x80   : >> { %s757_s13 = scalar_lea.vmem %s1849_s12, 3 [#allocation2]  ;;  %s313_s16 = sadd.s32 %s312_s23, %s1835_s21 }
  0x81   : >> { %s2419_s29 = smov (!%p2382_p2, %s294_s29), 255  ;;  %s1933_s11 = sld [smem:[#allocation5 + %s313_s16]] }
  0x82   : >> { %s939_s19 = sshll.u32 %s2419_s29, 4 }
  0x83   : >> { %s298_s7 = scalar_lea.hbm %s2340_s2, %s939_s19 }
  0x84   : >> { %s1244_s9 = scalar_lea.hbm %s298_s7, 16  ;;  %p1247_p3 = scmp.lt.u32.totalorder %s298_s7, %s2340_s2 }
  0x85   : >> { %p1245_p12 = scmp.ne.s32.totalorder %s298_s7, %s1244_s9  ;;  %p1248_p4 = scmp.lt.u32.totalorder %s1883_s10, %s1244_s9 }
  0x86   : >> { %p1250_p6 = scmp.lt.u32.totalorder %s1244_s9, %s298_s7 }
  0x87   : >> { %p1249_p5 = por %p1248_p4, %p1247_p3 }
  0x89   : >> { %p1251_p10 = por %p1250_p6, %p1249_p5 }
  0x8b   : >> { %p1252_p7 = pnand %p1251_p10, %p1245_p12 }
  0x8d   : >> { %1255 = shalt.err (!%p1252_p7)  }
  0x8e   : >> { %s1256_s27 = scalar_lea.vmem %s1912_s0, 16  ;;  %p1261_p9 = scmp.lt.s32.totalorder %s1912_s0, %s1891_s5 }
  0x8f   : >> { %p1257_p11 = scmp.ne.s32.totalorder %s1912_s0, %s1256_s27  ;;  %p1262_p0 = scmp.lt.s32.totalorder %s1894_s24, %s1256_s27 }
  0x91   : >> { %p1263_p1 = por %p1262_p0, %p1261_p9 }
  0x93   : >> { %p1264_p2 = pnand %p1263_p1, %p1257_p11 }
  0x95   : >> { %1267 = shalt.err (!%p1264_p2)  }
  0x96   : >> { %311 = dma.hbm_to_vmem [thread:$0]  %s298_s7, 16, %s1912_s0, %s1878_s15 }
  0x97   : >> { %s330_s3 = sshll.u32 %s757_s13, 4  ;;  %s334_s18 = sadd.s32 4, %s1844_s8  ;;  %s1951_s3 = int_to_ptr.vmem [resolvable:$true] %s330_s3 }
  0x98   : >> { %s335_s29 = sadd.s32 %s334_s18, %s1835_s21  ;;  %s764_s23 = scalar_lea.vmem %s1849_s12, 4 [#allocation2] }
  0x99   : >> { %s1948_s4 = sld [smem:[#allocation5 + %s335_s29]]  ;;  %s356_s19 = sadd.s32 5, %s1844_s8 }
  0x9a   : >> { %p315_p12 = scmp.gt.s32.totalorder %s1933_s11, 0  ;;  %p942_p3 = scmp.lt.s32.totalorder %s1933_s11, 255 }
  0x9b   : >> { %s352_s16 = sshll.u32 %s764_s23, 4  ;;  %s357_s6 = sadd.s32 %s356_s19, %s1835_s21  ;;  %s1962_s16 = int_to_ptr.vmem [resolvable:$true] %s352_s16 }
  0x9c   : >> { %s2421_s11 = smov (!%p315_p12, %s1933_s11), 0  ;;  %s1958_s20 = sld [smem:[#allocation5 + %s357_s6]] }
  0x9d   : >> { %s771_s0 = scalar_lea.vmem %s1849_s12, 5 [#allocation2]  ;;  %s2423_s11 = smov (!%p942_p3, %s2421_s11), 255 }
  0x9e   : >> { %s947_s13 = sshll.u32 %s2423_s11, 4  ;;  %s1968_s27 = sshll.u32 %s771_s0, 4  ;;  %s375_s27 = int_to_ptr.vmem [resolvable:$true] %s1968_s27 }
  0x9f   : >> { %s320_s1 = scalar_lea.hbm %s2340_s2, %s947_s13 }
  0xa0   : >> { %s1268_s18 = scalar_lea.hbm %s320_s1, 16  ;;  %p1271_p10 = scmp.lt.u32.totalorder %s320_s1, %s2340_s2 }
  0xa1   : >> { %p1269_p6 = scmp.ne.s32.totalorder %s320_s1, %s1268_s18  ;;  %p1272_p7 = scmp.lt.u32.totalorder %s1883_s10, %s1268_s18 }
  0xa2   : >> { %p1274_p9 = scmp.lt.u32.totalorder %s1268_s18, %s320_s1 }
  0xa3   : >> { %p1273_p11 = por %p1272_p7, %p1271_p10 }
  0xa5   : >> { %p1275_p0 = por %p1274_p9, %p1273_p11 }
  0xa7   : >> { %p1276_p1 = pnand %p1275_p0, %p1269_p6 }
  0xa9   : >> { %1279 = shalt.err (!%p1276_p1)  }
  0xaa   : >> { %s1280_s11 = scalar_lea.vmem %s1951_s3, 16  ;;  %p1285_p12 = scmp.lt.s32.totalorder %s1951_s3, %s1891_s5 }
  0xab   : >> { %p1281_p2 = scmp.ne.s32.totalorder %s1951_s3, %s1280_s11  ;;  %p1286_p3 = scmp.lt.s32.totalorder %s1894_s24, %s1280_s11 }
  0xad   : >> { %p1287_p5 = por %p1286_p3, %p1285_p12 }
  0xaf   : >> { %p1288_p4 = pnand %p1287_p5, %p1281_p2 }
  0xb1   : >> { %1291 = shalt.err (!%p1288_p4)  }
  0xb2   : >> { %333 = dma.hbm_to_vmem [thread:$0]  %s320_s1, 16, %s1951_s3, %s1878_s15 }
  0xb3   : >> { %p2383_p6 = scmp.gt.s32.totalorder %s1948_s4, 0  ;;  %p359_p10 = scmp.gt.s32.totalorder %s1958_s20, 0 }
  0xb4   : >> { %p2384_p11 = scmp.lt.s32.totalorder %s1948_s4, 255  ;;  %s378_s13 = sadd.s32 6, %s1844_s8 }
  0xb5   : >> { %s338_s19 = scalar_select %p2383_p6, %s1948_s4, 0 }
  0xb6   : >> { %s360_s6 = scalar_select %p359_p10, %s1958_s20, 0 }
  0xb7   : >> { %s2425_s19 = smov (!%p2384_p11, %s338_s19), 255  ;;  %s379_s29 = sadd.s32 %s378_s13, %s1835_s21 }
  0xb8   : >> { %s955_s0 = sshll.u32 %s2425_s19, 4 }
  0xb9   : >> { %s342_s18 = scalar_lea.hbm %s2340_s2, %s955_s0 }
  0xba   : >> { %s1292_s23 = scalar_lea.hbm %s342_s18, 16  ;;  %p1295_p5 = scmp.lt.u32.totalorder %s342_s18, %s2340_s2 }
  0xbb   : >> { %p1293_p4 = scmp.ne.s32.totalorder %s342_s18, %s1292_s23  ;;  %p1296_p9 = scmp.lt.u32.totalorder %s1883_s10, %s1292_s23 }
  0xbc   : >> { %p1298_p1 = scmp.lt.u32.totalorder %s1292_s23, %s342_s18 }
  0xbd   : >> { %p1297_p0 = por %p1296_p9, %p1295_p5 }
  0xbf   : >> { %p1299_p2 = por %p1298_p1, %p1297_p0 }
  0xc1   : >> { %p1300_p12 = pnand %p1299_p2, %p1293_p4 }
  0xc3   : >> { %1303 = shalt.err (!%p1300_p12)  }
  0xc4   : >> { %s1304_s3 = scalar_lea.vmem %s1962_s16, 16  ;;  %p1309_p6 = scmp.lt.s32.totalorder %s1962_s16, %s1891_s5 }
  0xc5   : >> { %p1305_p3 = scmp.ne.s32.totalorder %s1962_s16, %s1304_s3  ;;  %p1310_p10 = scmp.lt.s32.totalorder %s1894_s24, %s1304_s3 }
  0xc7   : >> { %p1311_p11 = por %p1310_p10, %p1309_p6 }
  0xc9   : >> { %p1312_p7 = pnand %p1311_p11, %p1305_p3 }
  0xcb   : >> { %1315 = shalt.err (!%p1312_p7)  }
  0xcc   : >> { %355 = dma.hbm_to_vmem [thread:$0]  %s342_s18, 16, %s1962_s16, %s1878_s15 }
  0xcd   : >> { %p2385_p4 = scmp.lt.s32.totalorder %s1958_s20, 255  ;;  %s380_s17 = sld [smem:[#allocation5 + %s379_s29]] }
  0xcf   : >> { %s2427_s6 = smov (!%p2385_p4, %s360_s6), 255 }
  0xd0   : >> { %s963_s4 = sshll.u32 %s2427_s6, 4 }
  0xd1   : >> { %s364_s0 = scalar_lea.hbm %s2340_s2, %s963_s4 }
  0xd2   : >> { %s1316_s13 = scalar_lea.hbm %s364_s0, 16  ;;  %p1319_p7 = scmp.lt.u32.totalorder %s364_s0, %s2340_s2 }
  0xd3   : >> { %p1317_p5 = scmp.ne.s32.totalorder %s364_s0, %s1316_s13  ;;  %p1320_p9 = scmp.lt.u32.totalorder %s1883_s10, %s1316_s13 }
  0xd4   : >> { %p1322_p1 = scmp.lt.u32.totalorder %s1316_s13, %s364_s0 }
  0xd5   : >> { %p1321_p0 = por %p1320_p9, %p1319_p7 }
  0xd7   : >> { %p1323_p2 = por %p1322_p1, %p1321_p0 }
  0xd9   : >> { %p1324_p12 = pnand %p1323_p2, %p1317_p5 }
  0xdb   : >> { %1327 = shalt.err (!%p1324_p12)  }
  0xdc   : >> { %s1328_s16 = scalar_lea.vmem %s375_s27, 16  ;;  %p1333_p6 = scmp.lt.s32.totalorder %s375_s27, %s1891_s5 }
  0xdd   : >> { %p1329_p3 = scmp.ne.s32.totalorder %s375_s27, %s1328_s16  ;;  %p1334_p10 = scmp.lt.s32.totalorder %s1894_s24, %s1328_s16 }
  0xdf   : >> { %p1335_p11 = por %p1334_p10, %p1333_p6 }
  0xe1   : >> { %p1336_p4 = pnand %p1335_p11, %p1329_p3 }
  0xe3   : >> { %1339 = shalt.err (!%p1336_p4)  }
  0xe4   : >> { %377 = dma.hbm_to_vmem [thread:$0]  %s364_s0, 16, %s375_s27, %s1878_s15 }
  0xe5   : >> { %s778_s20 = scalar_lea.vmem %s1849_s12, 6 [#allocation2]  ;;  %s400_s6 = sadd.s32 7, %s1844_s8 }
  0xe6   : >> { %s401_s18 = sadd.s32 %s400_s6, %s1835_s21  ;;  %p381_p5 = scmp.gt.s32.totalorder %s380_s17, 0 }
  0xe7   : >> { %p966_p7 = scmp.lt.s32.totalorder %s380_s17, 255  ;;  %s396_s29 = sshll.u32 %s778_s20, 4  ;;  %s397_s29 = int_to_ptr.vmem [resolvable:$true] %s396_s29 }
  0xe8   : >> { %s402_s23 = sld [smem:[#allocation5 + %s401_s18]]  ;;  %s2429_s17 = smov (!%p381_p5, %s380_s17), 0 }
  0xe9   : >> { %s2431_s17 = smov (!%p966_p7, %s2429_s17), 255  ;;  %s785_s3 = scalar_lea.vmem %s1849_s12, 7 [#allocation2] }
  0xea   : >> { %s971_s11 = sshll.u32 %s2431_s17, 4 }
  0xeb   : >> { %s386_s19 = scalar_lea.hbm %s2340_s2, %s971_s11 }
  0xec   : >> { %s1340_s13 = scalar_lea.hbm %s386_s19, 16  ;;  %p1343_p1 = scmp.lt.u32.totalorder %s386_s19, %s2340_s2 }
  0xed   : >> { %p1341_p0 = scmp.ne.s32.totalorder %s386_s19, %s1340_s13  ;;  %p1344_p2 = scmp.lt.u32.totalorder %s1883_s10, %s1340_s13 }
  0xee   : >> { %p1346_p3 = scmp.lt.u32.totalorder %s1340_s13, %s386_s19 }
  0xef   : >> { %p1345_p12 = por %p1344_p2, %p1343_p1 }
  0xf1   : >> { %p1347_p6 = por %p1346_p3, %p1345_p12 }
  0xf3   : >> { %p1348_p10 = pnand %p1347_p6, %p1341_p0 }
  0xf5   : >> { %1351 = shalt.err (!%p1348_p10)  }
  0xf6   : >> { %s1352_s0 = scalar_lea.vmem %s397_s29, 16  ;;  %p1357_p4 = scmp.lt.s32.totalorder %s397_s29, %s1891_s5 }
  0xf7   : >> { %p1353_p11 = scmp.ne.s32.totalorder %s397_s29, %s1352_s0  ;;  %p1358_p5 = scmp.lt.s32.totalorder %s1894_s24, %s1352_s0 }
  0xf9   : >> { %p1359_p7 = por %p1358_p5, %p1357_p4 }
  0xfb   : >> { %p1360_p9 = pnand %p1359_p7, %p1353_p11 }
  0xfd   : >> { %1363 = shalt.err (!%p1360_p9)  }
  0xfe   : >> { %399 = dma.hbm_to_vmem [thread:$0]  %s386_s19, 16, %s397_s29, %s1878_s15 }
  0xff   : >> { %p2386_p13 = scmp.gt.s32.totalorder %s402_s23, 0  ;;  %p974_p8 = scmp.lt.s32.totalorder %s402_s23, 255 }
 0x100   : >> { %s418_s17 = sshll.u32 %s785_s3, 4  ;;  %s419_s17 = int_to_ptr.vmem [resolvable:$true] %s418_s17 }
 0x101   : >> { %s404_s12 = scalar_select %p2386_p13, %s402_s23, 0 }
 0x103   : >> { %s2433_s12 = smov (!%p974_p8, %s404_s12), 255 }
 0x104   : >> { %s979_s7 = sshll.u32 %s2433_s12, 4 }
 0x105   : >> { %s408_s20 = scalar_lea.hbm %s2340_s2, %s979_s7 }
 0x106   : >> { %s1364_s6 = scalar_lea.hbm %s408_s20, 16  ;;  %p1367_p9 = scmp.lt.u32.totalorder %s408_s20, %s2340_s2 }
 0x107   : >> { %p1365_p0 = scmp.ne.s32.totalorder %s408_s20, %s1364_s6  ;;  %p1368_p1 = scmp.lt.u32.totalorder %s1883_s10, %s1364_s6 }
 0x108   : >> { %p1370_p12 = scmp.lt.u32.totalorder %s1364_s6, %s408_s20 }
 0x109   : >> { %p1369_p2 = por %p1368_p1, %p1367_p9 }
 0x10b   : >> { %p1371_p3 = por %p1370_p12, %p1369_p2 }
 0x10d   : >> { %p1372_p13 = pnand %p1371_p3, %p1365_p0 }
 0x10f   : >> { %1375 = shalt.err (!%p1372_p13)  }
 0x110   : >> { %s1376_s29 = scalar_lea.vmem %s419_s17, 16  ;;  %p1381_p6 = scmp.lt.s32.totalorder %s419_s17, %s1891_s5 }
 0x111   : >> { %p1377_p8 = scmp.ne.s32.totalorder %s419_s17, %s1376_s29  ;;  %p1382_p10 = scmp.lt.s32.totalorder %s1894_s24, %s1376_s29 }
 0x113   : >> { %p1383_p11 = por %p1382_p10, %p1381_p6 }
 0x115   : >> { %p1384_p4 = pnand %p1383_p11, %p1377_p8 }
 0x117   : >> { %1387 = shalt.err (!%p1384_p4)  }
 0x118   : >> { %421 = dma.hbm_to_vmem [thread:$0]  %s408_s20, 16, %s419_s17, %s1878_s15 }
 0x119   : >> { %s243_s30 = sadd.s32 1, %s1690_s30  }
 0x11a   : >> { %p240_p5 = scmp.ge.s32.totalorder %s243_s30, 2  }
 0x11c   : > { %242 = sbr.rel (!%p240_p5) target bundleno = 67 (0x43), region = 193 }
 0x123 PF: > { %s422_s10 = sadd.s32 1, %s1670_s25 }
 0x124   : > { %p982_p7 = scmp.ge.s32.totalorder %s422_s10, 2 }
 0x125   : > { %s427_s5 = ssub.s32 (!%p982_p7), 1, %s1818_s22  ;;  %s1074_s24 = sshll.u32 (!%p982_p7), %s1670_s25, 5 }
 0x126   : > { %426 = sbr.rel (%p982_p7) target bundleno = 521 (0x209), region = 79  ;;  %s1075_s23 = sadd.s32 (!%p982_p7), 32, %s1074_s24 }
 0x127   : > { %s984_s3 = sshll.u32 (!%p982_p7), %s1674_s26, 4  ;;  %s2052_s15 = smov (!%p982_p7), 0  }
 0x128   : > { %s2050_s4 = sadd.s32 (!%p982_p7), %s1075_s23, %s984_s3 }
 0x12d LB: >> { %s992_s21 = sshll.u32 %s427_s5, 4  ;;  %s2060_s30 = sshll.u32 %s1694_s15, 3  ;;  %s1694_s15 = sphi %s2052_s15, %s436_s15  }
 0x12e   : >> { %s438_s26 = sadd.s32 %s2060_s30, %s2050_s4  ;;  %s447_s1 = sadd.s32 %s992_s21, %s2060_s30 }
 0x12f   : >> { %s439_s19 = sld [smem:[#allocation5 + %s438_s26]]  ;;  %s2065_s13 = scalar_lea.vmem [#allocation2], %s447_s1 }
 0x130   : >> { %s457_s27 = sshll.u32 %s2065_s13, 4  ;;  %s461_s8 = sadd.s32 1, %s2060_s30  ;;  %s2069_s27 = int_to_ptr.vmem [resolvable:$true] %s457_s27 }
 0x131   : >> { %s462_s0 = sadd.s32 %s461_s8, %s2050_s4  ;;  %s799_s17 = scalar_lea.vmem %s2065_s13, 1 [#allocation2] }
 0x132   : >> { %s2072_s12 = sld [smem:[#allocation5 + %s462_s0]]  ;;  %s479_s7 = sshll.u32 %s799_s17, 4  ;;  %s2076_s7 = int_to_ptr.vmem [resolvable:$true] %s479_s7 }
 0x133   : >> { %s483_s9 = sadd.s32 2, %s2060_s30  ;;  %s806_s6 = scalar_lea.vmem %s2065_s13, 2 [#allocation2] }
 0x134   : >> { %s484_s16 = sadd.s32 %s483_s9, %s2050_s4  ;;  %s2087_s29 = sshll.u32 %s806_s6, 4  ;;  %s2129_s29 = int_to_ptr.vmem [resolvable:$true] %s2087_s29 }
 0x135   : >> { %p440_p0 = scmp.gt.s32.totalorder %s439_s19, 0  ;;  %p986_p9 = scmp.lt.s32.totalorder %s439_s19, 255 }
 0x136   : >> { %s2079_s20 = sld [smem:[#allocation5 + %s484_s16]]  ;;  %s2095_s3 = scalar_lea.sflag [#allocation3], %s427_s5 }
 0x137   : >> { %s2435_s19 = smov (!%p440_p0, %s439_s19), 0  ;;  %s2100_s8 = scalar_lea.hbm %s2340_s2, 4096 }
 0x138   : >> { %p464_p1 = scmp.gt.s32.totalorder %s2072_s12, 0  ;;  %p993_p2 = scmp.lt.s32.totalorder %s2072_s12, 255 }
 0x139   : >> { %s2437_s19 = smov (!%p986_p9, %s2435_s19), 255 }
 0x13a   : >> { %s2085_s18 = scalar_select %p464_p1, %s2072_s12, 0 }
 0x13b   : >> { %s991_s11 = sshll.u32 %s2437_s19, 4 }
 0x13c   : >> { %s445_s23 = scalar_lea.hbm %s2340_s2, %s991_s11  ;;  %p486_p12 = scmp.gt.s32.totalorder %s2079_s20, 0 }
 0x13d   : >> { %s1388_s21 = scalar_lea.hbm %s445_s23, 16  ;;  %p1391_p13 = scmp.lt.u32.totalorder %s445_s23, %s2340_s2 }
 0x13e   : >> { %p1389_p3 = scmp.ne.s32.totalorder %s445_s23, %s1388_s21  ;;  %p1392_p8 = scmp.lt.u32.totalorder %s2100_s8, %s1388_s21 }
 0x13f   : >> { %p1394_p10 = scmp.lt.u32.totalorder %s1388_s21, %s445_s23 }
 0x140   : >> { %p1393_p6 = por %p1392_p8, %p1391_p13 }
 0x142   : >> { %p1395_p11 = por %p1394_p10, %p1393_p6 }
 0x144   : >> { %p1396_p4 = pnand %p1395_p11, %p1389_p3 }
 0x146   : >> { %1399 = shalt.err (!%p1396_p4)  }
 0x147   : >> { %s1400_s19 = scalar_lea.vmem %s2069_s27, 16  ;;  %s1698_s9 = smov [#allocation2]  }
 0x148   : >> { %p1401_p5 = scmp.ne.s32.totalorder %s2069_s27, %s1400_s19  ;;  %s1402_s16 = sshll.u32 %s1698_s9, 4  ;;  %s2108_s16 = int_to_ptr.vmem [resolvable:$false] %s1402_s16 }
 0x149   : >> { %s2111_s6 = scalar_lea.vmem %s2108_s16, 512  ;;  %p1405_p7 = scmp.lt.s32.totalorder %s2069_s27, %s2108_s16 }
 0x14a   : >> { %p1406_p0 = scmp.lt.s32.totalorder %s2111_s6, %s1400_s19 }
 0x14c   : >> { %p1407_p9 = por %p1406_p0, %p1405_p7 }
 0x14e   : >> { %p1408_p1 = pnand %p1407_p9, %p1401_p5 }
 0x150   : >> { %1411 = shalt.err (!%p1408_p1)  }
 0x151   : >> { %460 = dma.hbm_to_vmem [thread:$0]  %s445_s23, 16, %s2069_s27, %s2095_s3 }
 0x152   : >> { %s2439_s18 = smov (!%p993_p2, %s2085_s18), 255  ;;  %p1001_p3 = scmp.lt.s32.totalorder %s2079_s20, 255 }
 0x153   : >> { %s487_s11 = scalar_select %p486_p12, %s2079_s20, 0 }
 0x154   : >> { %s998_s10 = sshll.u32 %s2439_s18, 4 }
 0x155   : >> { %s469_s26 = scalar_lea.hbm %s2340_s2, %s998_s10 }
 0x156   : >> { %s1412_s1 = scalar_lea.hbm %s469_s26, 16  ;;  %p1415_p8 = scmp.lt.u32.totalorder %s469_s26, %s2340_s2 }
 0x157   : >> { %p1413_p13 = scmp.ne.s32.totalorder %s469_s26, %s1412_s1  ;;  %p1416_p6 = scmp.lt.u32.totalorder %s2100_s8, %s1412_s1 }
 0x158   : >> { %p1418_p11 = scmp.lt.u32.totalorder %s1412_s1, %s469_s26 }
 0x159   : >> { %p1417_p10 = por %p1416_p6, %p1415_p8 }
 0x15b   : >> { %p1419_p2 = por %p1418_p11, %p1417_p10 }
 0x15d   : >> { %p1420_p4 = pnand %p1419_p2, %p1413_p13 }
 0x15f   : >> { %1423 = shalt.err (!%p1420_p4)  }
 0x160   : >> { %s1424_s27 = scalar_lea.vmem %s2076_s7, 16  ;;  %p1429_p5 = scmp.lt.s32.totalorder %s2076_s7, %s2108_s16 }
 0x161   : >> { %p1425_p12 = scmp.ne.s32.totalorder %s2076_s7, %s1424_s27  ;;  %p1430_p7 = scmp.lt.s32.totalorder %s2111_s6, %s1424_s27 }
 0x163   : >> { %p1431_p0 = por %p1430_p7, %p1429_p5 }
 0x165   : >> { %p1432_p9 = pnand %p1431_p0, %p1425_p12 }
 0x167   : >> { %1435 = shalt.err (!%p1432_p9)  }
 0x168   : >> { %482 = dma.hbm_to_vmem [thread:$0]  %s469_s26, 16, %s2076_s7, %s2095_s3 }
 0x169   : >> { %s2441_s11 = smov (!%p1001_p3, %s487_s11), 255  ;;  %s505_s12 = sadd.s32 3, %s2060_s30 }
 0x16a   : >> { %s813_s18 = scalar_lea.vmem %s2065_s13, 3 [#allocation2]  ;;  %s1006_s23 = sshll.u32 %s2441_s11, 4 }
 0x16b   : >> { %s506_s19 = sadd.s32 %s505_s12, %s2050_s4  ;;  %s491_s24 = scalar_lea.hbm %s2340_s2, %s1006_s23 }
 0x16c   : >> { %s2150_s21 = sld [smem:[#allocation5 + %s506_s19]]  ;;  %s1436_s1 = scalar_lea.hbm %s491_s24, 16 }
 0x16d   : >> { %p1437_p1 = scmp.ne.s32.totalorder %s491_s24, %s1436_s1  ;;  %p1439_p13 = scmp.lt.u32.totalorder %s491_s24, %s2340_s2 }
 0x16e   : >> { %p1440_p8 = scmp.lt.u32.totalorder %s2100_s8, %s1436_s1  ;;  %p1442_p10 = scmp.lt.u32.totalorder %s1436_s1, %s491_s24 }
 0x170   : >> { %p1441_p6 = por %p1440_p8, %p1439_p13 }
 0x172   : >> { %p1443_p3 = por %p1442_p10, %p1441_p6 }
 0x174   : >> { %p1444_p11 = pnand %p1443_p3, %p1437_p1 }
 0x176   : >> { %1447 = shalt.err (!%p1444_p11)  }
 0x177   : >> { %s1448_s7 = scalar_lea.vmem %s2129_s29, 16  ;;  %p1453_p4 = scmp.lt.s32.totalorder %s2129_s29, %s2108_s16 }
 0x178   : >> { %p1449_p2 = scmp.ne.s32.totalorder %s2129_s29, %s1448_s7  ;;  %p1454_p12 = scmp.lt.s32.totalorder %s2111_s6, %s1448_s7 }
 0x17a   : >> { %p1455_p5 = por %p1454_p12, %p1453_p4 }
 0x17c   : >> { %p1456_p7 = pnand %p1455_p5, %p1449_p2 }
 0x17e   : >> { %1459 = shalt.err (!%p1456_p7)  }
 0x17f   : >> { %504 = dma.hbm_to_vmem [thread:$0]  %s491_s24, 16, %s2129_s29, %s2095_s3 }
 0x180   : >> { %s523_s20 = sshll.u32 %s813_s18, 4  ;;  %s527_s11 = sadd.s32 4, %s2060_s30  ;;  %s2168_s20 = int_to_ptr.vmem [resolvable:$true] %s523_s20 }
 0x181   : >> { %s528_s26 = sadd.s32 %s527_s11, %s2050_s4  ;;  %s820_s12 = scalar_lea.vmem %s2065_s13, 4 [#allocation2] }
 0x182   : >> { %s2165_s27 = sld [smem:[#allocation5 + %s528_s26]]  ;;  %s549_s23 = sadd.s32 5, %s2060_s30 }
 0x183   : >> { %p508_p0 = scmp.gt.s32.totalorder %s2150_s21, 0  ;;  %p1009_p9 = scmp.lt.s32.totalorder %s2150_s21, 255 }
 0x184   : >> { %s545_s19 = sshll.u32 %s820_s12, 4  ;;  %s550_s9 = sadd.s32 %s549_s23, %s2050_s4  ;;  %s2179_s19 = int_to_ptr.vmem [resolvable:$true] %s545_s19 }
 0x185   : >> { %s2443_s21 = smov (!%p508_p0, %s2150_s21), 0  ;;  %s2175_s10 = sld [smem:[#allocation5 + %s550_s9]] }
 0x186   : >> { %s827_s29 = scalar_lea.vmem %s2065_s13, 5 [#allocation2]  ;;  %s2445_s21 = smov (!%p1009_p9, %s2443_s21), 255 }
 0x187   : >> { %s1014_s18 = sshll.u32 %s2445_s21, 4  ;;  %s2185_s17 = sshll.u32 %s827_s29, 4  ;;  %s568_s17 = int_to_ptr.vmem [resolvable:$true] %s2185_s17 }
 0x188   : >> { %p530_p1 = scmp.gt.s32.totalorder %s2165_s27, 0  ;;  %p1017_p13 = scmp.lt.s32.totalorder %s2165_s27, 255 }
 0x189   : >> { %s513_s0 = scalar_lea.hbm %s2340_s2, %s1014_s18 }
 0x18a   : >> { %s1460_s7 = scalar_lea.hbm %s513_s0, 16  ;;  %p1463_p6 = scmp.lt.u32.totalorder %s513_s0, %s2340_s2 }
 0x18b   : >> { %p1461_p8 = scmp.ne.s32.totalorder %s513_s0, %s1460_s7  ;;  %p1464_p10 = scmp.lt.u32.totalorder %s2100_s8, %s1460_s7 }
 0x18c   : >> { %p1466_p11 = scmp.lt.u32.totalorder %s1460_s7, %s513_s0 }
 0x18d   : >> { %p1465_p3 = por %p1464_p10, %p1463_p6 }
 0x18f   : >> { %p1467_p2 = por %p1466_p11, %p1465_p3 }
 0x191   : >> { %p1468_p4 = pnand %p1467_p2, %p1461_p8 }
 0x193   : >> { %1471 = shalt.err (!%p1468_p4)  }
 0x194   : >> { %s1472_s21 = scalar_lea.vmem %s2168_s20, 16  ;;  %p1477_p5 = scmp.lt.s32.totalorder %s2168_s20, %s2108_s16 }
 0x195   : >> { %p1473_p12 = scmp.ne.s32.totalorder %s2168_s20, %s1472_s21  ;;  %p1478_p7 = scmp.lt.s32.totalorder %s2111_s6, %s1472_s21 }
 0x197   : >> { %p1479_p0 = por %p1478_p7, %p1477_p5 }
 0x199   : >> { %p1480_p9 = pnand %p1479_p0, %p1473_p12 }
 0x19b   : >> { %1483 = shalt.err (!%p1480_p9)  }
 0x19c   : >> { %526 = dma.hbm_to_vmem [thread:$0]  %s513_s0, 16, %s2168_s20, %s2095_s3 }
 0x19d   : >> { %s531_s12 = scalar_select %p530_p1, %s2165_s27, 0 }
 0x19e   : >> { %p552_p8 = scmp.gt.s32.totalorder %s2175_s10, 0  ;;  %p1025_p6 = scmp.lt.s32.totalorder %s2175_s10, 255 }
 0x19f   : >> { %s2447_s12 = smov (!%p1017_p13, %s531_s12), 255  ;;  %s571_s29 = sadd.s32 6, %s2060_s30 }
 0x1a0   : >> { %s553_s23 = scalar_select %p552_p8, %s2175_s10, 0 }
 0x1a1   : >> { %s1022_s9 = sshll.u32 %s2447_s12, 4  ;;  %s572_s7 = sadd.s32 %s571_s29, %s2050_s4 }
 0x1a2   : >> { %s535_s1 = scalar_lea.hbm %s2340_s2, %s1022_s9 }
 0x1a3   : >> { %s1484_s11 = scalar_lea.hbm %s535_s1, 16  ;;  %p1487_p3 = scmp.lt.u32.totalorder %s535_s1, %s2340_s2 }
 0x1a4   : >> { %p1485_p10 = scmp.ne.s32.totalorder %s535_s1, %s1484_s11  ;;  %p1488_p11 = scmp.lt.u32.totalorder %s2100_s8, %s1484_s11 }
 0x1a5   : >> { %p1490_p2 = scmp.lt.u32.totalorder %s1484_s11, %s535_s1 }
 0x1a6   : >> { %p1489_p1 = por %p1488_p11, %p1487_p3 }
 0x1a8   : >> { %p1491_p4 = por %p1490_p2, %p1489_p1 }
 0x1aa   : >> { %p1492_p12 = pnand %p1491_p4, %p1485_p10 }
 0x1ac   : >> { %1495 = shalt.err (!%p1492_p12)  }
 0x1ad   : >> { %s1496_s20 = scalar_lea.vmem %s2179_s19, 16  ;;  %p1501_p5 = scmp.lt.s32.totalorder %s2179_s19, %s2108_s16 }
 0x1ae   : >> { %p1497_p13 = scmp.ne.s32.totalorder %s2179_s19, %s1496_s20  ;;  %p1502_p7 = scmp.lt.s32.totalorder %s2111_s6, %s1496_s20 }
 0x1b0   : >> { %p1503_p0 = por %p1502_p7, %p1501_p5 }
 0x1b2   : >> { %p1504_p9 = pnand %p1503_p0, %p1497_p13 }
 0x1b4   : >> { %1507 = shalt.err (!%p1504_p9)  }
 0x1b5   : >> { %548 = dma.hbm_to_vmem [thread:$0]  %s535_s1, 16, %s2179_s19, %s2095_s3 }
 0x1b6   : >> { %s2449_s23 = smov (!%p1025_p6, %s553_s23), 255  ;;  %s573_s27 = sld [smem:[#allocation5 + %s572_s7]] }
 0x1b7   : >> { %s1030_s0 = sshll.u32 %s2449_s23, 4 }
 0x1b8   : >> { %s557_s29 = scalar_lea.hbm %s2340_s2, %s1030_s0 }
 0x1b9   : >> { %s1508_s18 = scalar_lea.hbm %s557_s29, 16  ;;  %p1511_p10 = scmp.lt.u32.totalorder %s557_s29, %s2340_s2 }
 0x1ba   : >> { %p1509_p8 = scmp.ne.s32.totalorder %s557_s29, %s1508_s18  ;;  %p1512_p3 = scmp.lt.u32.totalorder %s2100_s8, %s1508_s18 }
 0x1bb   : >> { %p1514_p1 = scmp.lt.u32.totalorder %s1508_s18, %s557_s29 }
 0x1bc   : >> { %p1513_p11 = por %p1512_p3, %p1511_p10 }
 0x1be   : >> { %p1515_p2 = por %p1514_p1, %p1513_p11 }
 0x1c0   : >> { %p1516_p4 = pnand %p1515_p2, %p1509_p8 }
 0x1c2   : >> { %1519 = shalt.err (!%p1516_p4)  }
 0x1c3   : >> { %s1520_s19 = scalar_lea.vmem %s568_s17, 16  ;;  %p1525_p12 = scmp.lt.s32.totalorder %s568_s17, %s2108_s16 }
 0x1c4   : >> { %p1521_p6 = scmp.ne.s32.totalorder %s568_s17, %s1520_s19  ;;  %p1526_p13 = scmp.lt.s32.totalorder %s2111_s6, %s1520_s19 }
 0x1c6   : >> { %p1527_p5 = por %p1526_p13, %p1525_p12 }
 0x1c8   : >> { %p1528_p7 = pnand %p1527_p5, %p1521_p6 }
 0x1ca   : >> { %1531 = shalt.err (!%p1528_p7)  }
 0x1cb   : >> { %570 = dma.hbm_to_vmem [thread:$0]  %s557_s29, 16, %s568_s17, %s2095_s3 }
 0x1cc   : >> { %s834_s10 = scalar_lea.vmem %s2065_s13, 6 [#allocation2]  ;;  %s593_s23 = sadd.s32 7, %s2060_s30 }
 0x1cd   : >> { %s594_s1 = sadd.s32 %s593_s23, %s2050_s4  ;;  %p574_p0 = scmp.gt.s32.totalorder %s573_s27, 0 }
 0x1ce   : >> { %p1033_p9 = scmp.lt.s32.totalorder %s573_s27, 255  ;;  %s589_s7 = sshll.u32 %s834_s10, 4  ;;  %s590_s7 = int_to_ptr.vmem [resolvable:$true] %s589_s7 }
 0x1cf   : >> { %s595_s26 = sld [smem:[#allocation5 + %s594_s1]]  ;;  %s2451_s27 = smov (!%p574_p0, %s573_s27), 0 }
 0x1d0   : >> { %s2453_s27 = smov (!%p1033_p9, %s2451_s27), 255  ;;  %s841_s20 = scalar_lea.vmem %s2065_s13, 7 [#allocation2] }
 0x1d1   : >> { %s1038_s21 = sshll.u32 %s2453_s27, 4 }
 0x1d2   : >> { %s579_s9 = scalar_lea.hbm %s2340_s2, %s1038_s21 }
 0x1d3   : >> { %s1532_s18 = scalar_lea.hbm %s579_s9, 16  ;;  %p1535_p3 = scmp.lt.u32.totalorder %s579_s9, %s2340_s2 }
 0x1d4   : >> { %p1533_p10 = scmp.ne.s32.totalorder %s579_s9, %s1532_s18  ;;  %p1536_p11 = scmp.lt.u32.totalorder %s2100_s8, %s1532_s18 }
 0x1d5   : >> { %p596_p8 = scmp.gt.s32.totalorder %s595_s26, 0  ;;  %p1538_p2 = scmp.lt.u32.totalorder %s1532_s18, %s579_s9 }
 0x1d6   : >> { %p1537_p1 = por %p1536_p11, %p1535_p3 }
 0x1d8   : >> { %p1539_p4 = por %p1538_p2, %p1537_p1 }
 0x1da   : >> { %p1540_p6 = pnand %p1539_p4, %p1533_p10 }
 0x1dc   : >> { %1543 = shalt.err (!%p1540_p6)  }
 0x1dd   : >> { %s1544_s29 = scalar_lea.vmem %s590_s7, 16  ;;  %p1549_p13 = scmp.lt.s32.totalorder %s590_s7, %s2108_s16 }
 0x1de   : >> { %p1545_p12 = scmp.ne.s32.totalorder %s590_s7, %s1544_s29  ;;  %p1550_p5 = scmp.lt.s32.totalorder %s2111_s6, %s1544_s29 }
 0x1e0   : >> { %p1551_p7 = por %p1550_p5, %p1549_p13 }
 0x1e2   : >> { %p1552_p0 = pnand %p1551_p7, %p1545_p12 }
 0x1e4   : >> { %1555 = shalt.err (!%p1552_p0)  }
 0x1e5   : >> { %592 = dma.hbm_to_vmem [thread:$0]  %s579_s9, 16, %s590_s7, %s2095_s3 }
 0x1e6   : >> { %s597_s13 = scalar_select %p596_p8, %s595_s26, 0 }
 0x1e7   : >> { %p1041_p9 = scmp.lt.s32.totalorder %s595_s26, 255  ;;  %s611_s27 = sshll.u32 %s841_s20, 4  ;;  %s612_s27 = int_to_ptr.vmem [resolvable:$true] %s611_s27 }
 0x1e9   : >> { %s2455_s13 = smov (!%p1041_p9, %s597_s13), 255 }
 0x1ea   : >> { %s1046_s24 = sshll.u32 %s2455_s13, 4 }
 0x1eb   : >> { %s601_s10 = scalar_lea.hbm %s2340_s2, %s1046_s24 }
 0x1ec   : >> { %s1556_s23 = scalar_lea.hbm %s601_s10, 16  ;;  %p1559_p3 = scmp.lt.u32.totalorder %s601_s10, %s2340_s2 }
 0x1ed   : >> { %p1557_p10 = scmp.ne.s32.totalorder %s601_s10, %s1556_s23  ;;  %p1560_p11 = scmp.lt.u32.totalorder %s2100_s8, %s1556_s23 }
 0x1ee   : >> { %p1562_p2 = scmp.lt.u32.totalorder %s1556_s23, %s601_s10 }
 0x1ef   : >> { %p1561_p1 = por %p1560_p11, %p1559_p3 }
 0x1f1   : >> { %p1563_p4 = por %p1562_p2, %p1561_p1 }
 0x1f3   : >> { %p1564_p8 = pnand %p1563_p4, %p1557_p10 }
 0x1f5   : >> { %1567 = shalt.err (!%p1564_p8)  }
 0x1f6   : >> { %s1568_s7 = scalar_lea.vmem %s612_s27, 16  ;;  %p1573_p12 = scmp.lt.s32.totalorder %s612_s27, %s2108_s16 }
 0x1f7   : >> { %p1569_p6 = scmp.ne.s32.totalorder %s612_s27, %s1568_s7  ;;  %p1574_p13 = scmp.lt.s32.totalorder %s2111_s6, %s1568_s7 }
 0x1f9   : >> { %p1575_p5 = por %p1574_p13, %p1573_p12 }
 0x1fb   : >> { %p1576_p7 = pnand %p1575_p5, %p1569_p6 }
 0x1fd   : >> { %1579 = shalt.err (!%p1576_p7)  }
 0x1fe   : >> { %614 = dma.hbm_to_vmem [thread:$0]  %s601_s10, 16, %s612_s27, %s2095_s3 }
 0x1ff   : >> { %s436_s15 = sadd.s32 1, %s1694_s15  }
 0x200   : >> { %p433_p0 = scmp.ge.s32.totalorder %s436_s15, 2  }
 0x202   : > { %435 = sbr.rel (!%p433_p0) target bundleno = 301 (0x12d), region = 204 }
 0x209 PF: > { %s1049_s8 = sshll.u32 %s1818_s22, 4  ;;  %s617_s20 = scalar_lea.sflag [#allocation3], %s1818_s22 }
 0x20a   : > { %s616_s26 = scalar_lea.vmem [#allocation2], %s1049_s8 }
 0x20b   : > { %1650 = dma.done.wait %s617_s20, 256 }
 0x20c   : > { %1651 = vsyncadd %s617_s20, 4294967040  ;;  %v1699_v0 = vmov 0   ;;  %v623_v1 = vld [vmem:[%s1828_s28] sm:$0xff]  ;;  %v624_v2 = vld [vmem:[%s1828_s28 + $0x8] sm:$0xff]  ;;  %s2387_s5 = sld [smem:[#allocation56_spill]]  ;;  %v626_v5 = vlaneseq  ;;  %s2388_s15 = sld [smem:[#allocation59_spill]] }
 0x20d   : > { %1183 = vset.pattern.permute.xlu0 %v1699_v0  ;;  %vm630_vm0 = vcmp.eq.s32.totalorder %v623_v1, 1  ;;  %vm631_vm1 = vcmp.eq.s32.totalorder %v624_v2, 1  ;;  %s2389_s3 = sld [smem:[#allocation57_spill]]  ;;  %s1052_s28 = sshll.u32 %s1670_s25, 2  ;;  %v621_v13 = vld [vmem:[%s616_s26] sm:$0xff]  ;;  %v622_v18 = vld [vmem:[%s616_s26 + $0x8] sm:$0xff] }
 0x20e   : > { %v632_v3 = vsel %vm630_vm0, 1, %v1699_v0  ;;  %v633_v4 = vsel %vm631_vm1, 1, %v1699_v0  ;;  %v627_v6 = vshrl.u32 %v626_v5, 7  ;;  %v650_v14 = vld [vmem:[%s1823_s14] sm:$0xff]  ;;  %s2390_s6 = sld [smem:[#allocation46_spill]]  ;;  %s2391_s0 = sld [smem:[#allocation52_spill]] }
 0x20f   : > { %635 = vperm.xlu0 %1183, %v632_v3   ;;  %v651_v20 = vld [vmem:[%s1823_s14 + $0x8] sm:$0xff]  ;;  %s2392_s17 = sld [smem:[#allocation61_spill]]  ;;  %s1700_s14 = smov [#allocation6]  }
 0x210   : > { %v628_v7 = vsub.s32 0, %v627_v6  ;;  %v644_v8 = vsub.s32 1, %v627_v6  ;;  %s1584_s24 = sshll.u32 %s1700_s14, 4  ;;  %s1585_s24 = int_to_ptr.vmem [resolvable:$false] %s1584_s24 }
 0x211   : > { %s1586_s11 = scalar_lea.vmem %s1585_s24, 512 }
 0x212   : > { %v625_v9 = vld [vmem:[%s2388_s15] sm:$0x3]  ;;  %s669_s16 = sadd.s32 %s1052_s28, %s2387_s5 }
 0x213   : > { %638 = vperm.xlu0 %1183, %v633_v4   ;;  %v629_v10 = vrot.slane %v625_v9, %v628_v7  ;;  %v645_v11 = vrot.slane %v625_v9, %v644_v8  ;;  %s1053_s12 = sshll.u32 %s669_s16, 7  ;;  %s672_s9 = sshll.u32 %s2389_s3, 4  ;;  %s2281_s9 = int_to_ptr.vmem [resolvable:$true] %s672_s9 }
 0x214   : > { %s2393_s29 = sand.u32 1, %s2390_s6   ;;  %s1580_s27 = scalar_lea.vmem %s2281_s9, 256 }
 0x215   : > { %s2279_s30 = scalar_lea.hbm %s2392_s17, %s1053_s12  ;;  %s2286_s13 = scalar_lea.sflag [#allocation7], %s2393_s29 }
 0x216   : > { %p1581_p9 = scmp.ne.s32.totalorder %s2281_s9, %s1580_s27  ;;  %p2394_p10 = scmp.ne.s32.totalorder %s2391_s0, 0 }
 0x217   : > { %p1587_p1 = scmp.lt.s32.totalorder %s2281_s9, %s1585_s24  ;;  %p1588_p2 = scmp.lt.s32.totalorder %s1586_s11, %s1580_s27 }
 0x218   : > { %p1582_p3 = pnand %p1581_p9, %p2394_p10 }
 0x219   : > { %p1589_p4 = por %p1588_p2, %p1587_p1 }
 0x21a   : > { %p1583_p11 = pneg %p1582_p3 }
 0x21c   : > { %p1590_p8 = pnand %p1589_p4, %p1583_p11 }
 0x28e   : > { %v636_v12 = vpop.permute.xlu0 %635 }
 0x28f   : > { %vm640_vm2 = vcmp.eq.s32.totalorder %v636_v12, 1 }
 0x290   : > { %v646_v15 = vsel %vm640_vm2, %v645_v11, %v629_v10 }
 0x291   : > { %v648_v16 = vadd.f32 %v646_v15, %v621_v13 }
 0x292   : > { %v639_v17 = vpop.permute.xlu0 %638 }
 0x293   : > { %v652_v19 = vadd.f32 %v650_v14, %v648_v16  ;;  %vm641_vm3 = vcmp.eq.s32.totalorder %v639_v17, 1 }
 0x294   : > { %v647_v21 = vsel %vm641_vm3, %v645_v11, %v629_v10 }
 0x295   : > { %654 = vst [vmem:[%s2389_s3] sm:$0xff] %v652_v19  ;;  %v649_v22 = vadd.f32 %v647_v21, %v622_v18 }
 0x297   : > { %v653_v23 = vadd.f32 %v651_v20, %v649_v22 }
 0x299   : > { %655 = vst [vmem:[%s2389_s3 + $0x8] sm:$0xff] %v653_v23 }
 0x29a   : > { %1593 = shalt.err (!%p1590_p8)
}
 0x29b   : > { %s1594_s19 = scalar_lea.hbm %s2279_s30, 256  ;;  %s1598_s1 = scalar_lea.hbm %s2392_s17, 1024 }
 0x29c   : > { %p1595_p6 = scmp.ne.s32.totalorder %s2279_s30, %s1594_s19  ;;  %p1599_p5 = scmp.lt.u32.totalorder %s2279_s30, %s2392_s17 }
 0x29d   : > { %p1600_p7 = scmp.lt.u32.totalorder %s1598_s1, %s1594_s19  ;;  %p1602_p9 = scmp.lt.u32.totalorder %s1594_s19, %s2279_s30 }
 0x29e   : > { %p1596_p12 = pnand %p1595_p6, %p2394_p10 }
 0x29f   : > { %p1601_p0 = por %p1600_p7, %p1599_p5 }
 0x2a0   : > { %p1597_p13 = pneg %p1596_p12 }
 0x2a1   : > { %p1603_p3 = por %p1602_p9, %p1601_p0 }
 0x2a3   : > { %p1604_p11 = pnand %p1603_p3, %p1597_p13 }
 0x2a5   : > { %1607 = shalt.err (!%p1604_p11)
}
 0x2a6   : > { %s1701_s8 = smov 128   ;;  %s1702_s26 = smov 8  }
 0x2a7   : > { %1092 = dma.vmem_to_hbm [thread:$0]  (%p2394_p10), %s2281_s9, 256, %s2279_s30, %s2286_s13, %s1701_s8, %s1701_s8, %s1702_s26  }
 0x2a8 PF: > { %s2395_s20 = sld [smem:[#allocation50_spill]]  ;;  %s2396_s5 = sld [smem:[#allocation45_spill]] }
 0x2a9   : > { %s2397_s22 = sld [smem:[#allocation54_spill]] }
 0x2ae   : > { %p1098_p1 = scmp.ge.s32.totalorder %s2395_s20, 2  ;;  %s687_s4 = sand.u32 1, %s2396_s5  }
 0x2af   : > { %p2398_p2 = scmp.ne.s32.totalorder %s2397_s22, 0  ;;  %s688_s15 = scalar_lea.sflag [#allocation7], %s687_s4 }
 0x2b1   : > { %p1095_p4 = pnand %p1098_p1, %p2398_p2 }
 0x2b3   : > { %1653 = dma.done.wait (!%p1095_p4), %s688_s15, 256  }
 0x2b4   : > { %1655 = vsyncadd (!%p1095_p4), %s688_s15, 4294967040  ;;  %s24_s29 = sadd.s32 1, %s2395_s20   ;;  %s2399_s23 = sld [smem:[#allocation46_spill]] }
 0x2b5   : > { %p21_p8 = scmp.ge.s32.totalorder %s24_s29, 6   ;;  %s2400_s24 = sld [smem:[#allocation47_spill]] }
 0x2b6   : > { %s2401_s0 = sld [smem:[#allocation55_spill]]  ;;  %s2402_s25 = sld [smem:[#allocation48_spill]] }
 0x2b7   : > { %s2403_s26 = sld [smem:[#allocation49_spill]]  ;;  %s2404_s27 = sld [smem:[#allocation51_spill]] }
 0x2b8   : > { %s2405_s28 = sld [smem:[#allocation53_spill]]  ;;  %23 = sbr.rel (!%p21_p8) target bundleno = 22 (0x16), region = 215 }
 0x2bf   :  { %693 = vsyncpa [#allocation7], 1 }
 0x2c0   :  { %695 = vsyncpa [#allocation7 + $0x1], 1 }
 0x2c1   :  { %696 = vsyncmov [#allocation3] }
 0x2c4   :  { %s697_s3 = vpop.sfrf %696 }
 0x2c5   :  { %p1056_p10 = scmp.ne.s32.totalorder %s697_s3, 0 }
 0x2c7   :  { %701 = shalt.err (%p1056_p10)  }
 0x2c8   :  { %703 = vsyncmov [#allocation3 + $0x1] }
 0x2cb   :  { %s704_s16 = vpop.sfrf %703 }
 0x2cc   :  { %p1057_p6 = scmp.ne.s32.totalorder %s704_s16, 0 }
 0x2ce   :  { %708 = shalt.err (%p1057_p6)  }

</bundles_post_ra>
